<compile_context>
chip_gen: v5e
topology: v5e:2x2
jax: 0.10.0
libtpu: 0.0.40
codegen_flags: <defaults>
</compile_context>

<pallas_src>
import jax
import jax.numpy as jnp
from jax import lax
from jax.experimental import pallas as pl
from jax.experimental.pallas import tpu as pltpu


def _round_up(n, m):
    return ((n + m - 1) // m) * m


def _elu(x):
    # ELU with alpha=1.0 (F.elu default). Clamp the exp argument so the
    # unselected branch never produces inf.
    return jnp.where(x > 0, x, jnp.exp(jnp.minimum(x, 0.0)) - 1.0)


def mine_kernel(x_ref, w1_ref, b1_ref, w2_ref, b2_ref, w3_ref, b3_ref, o_ref):
    x = x_ref[...]                                   # (tb, in_size)
    in_size = x.shape[1]

    # ---- fc1: K is tiny -> VPU broadcast-MACs, skip the MXU entirely -------
    if in_size <= 8:
        h = x[:, 0:1] * w1_ref[0:1, :]               # (tb,1)*(1,H) -> (tb,H)
        for k in range(1, in_size):
            h = h + x[:, k:k + 1] * w1_ref[k:k + 1, :]
    else:
        h = jnp.dot(x, w1_ref[...], preferred_element_type=jnp.float32)
    h = _elu(h + b1_ref[...])                        # (tb, H)

    # ---- fc2: dense (tb,H)@(H,H) matmul on the MXU, f32 accumulate ---------
    h = jnp.dot(h, w2_ref[...], preferred_element_type=jnp.float32)
    h = _elu(h + b2_ref[...])                        # (tb, H)

    # ---- fc3: contract (1,H) with (tb,H) over H -> lane-dense (1, tb) ------
    # dot_general with RHS contracting on its last dim avoids materializing h.T.
    o = lax.dot_general(
        w3_ref[...], h,
        dimension_numbers=(((1,), (1,)), ((), ())),
        preferred_element_type=jnp.float32,
    )                                                # (1, tb)
    o_ref[...] = (o + b3_ref[0, 0]).astype(o_ref.dtype)


def mine_forward(x, params, *, tb=512):
    """x: (B, input_size) float32. params: (in,out)-layout weights (see init_params)."""
    B, in_size = x.shape
    H = params["w1"].shape[1]

    # Batch tile: multiple of 256, capped at 2048 for v7x VMEM safety, and no
    # larger than the padded batch itself.
    tb = max(256, min(int(tb), 2048))
    tb = _round_up(tb, 256)
    tb = min(tb, _round_up(B, 256))
    B_pad = _round_up(B, tb)
    if B_pad != B:
        x = jnp.pad(x, ((0, B_pad - B), (0, 0)))     # zero rows are harmless

    grid = (B_pad // tb,)
    full = lambda i: (0, 0)

    w3_row = params["w3"].reshape(1, H)              # (H,1) -> (1,H) row

    out = pl.pallas_call(
        mine_kernel,
        out_shape=jax.ShapeDtypeStruct((1, B_pad), jnp.float32),
        grid_spec=pltpu.PrefetchScalarGridSpec(
            num_scalar_prefetch=0,
            grid=grid,
            in_specs=[
                pl.BlockSpec((tb, in_size), lambda i: (i, 0)),      # x tile
                pl.BlockSpec((in_size, H), full),                   # w1
                pl.BlockSpec((1, H), full),                         # b1
                pl.BlockSpec((H, H), full),                         # w2
                pl.BlockSpec((1, H), full),                         # b2
                pl.BlockSpec((1, H), full),                         # w3 row
                pl.BlockSpec(memory_space=pltpu.MemorySpace.SMEM),  # b3 scalar
            ],
            out_specs=pl.BlockSpec((1, tb), lambda i: (0, i)),      # lane-dense
        ),
        compiler_params=pltpu.CompilerParams(
            dimension_semantics=("parallel",)),
    )(x, params["w1"], params["b1"], params["w2"], params["b2"],
      w3_row, params["b3"])

    return out[0, :B].reshape(B, 1)


def init_params(key, input_size=2, hidden_size=128):
    k1, k2, k3 = jax.random.split(key, 3)
    # nn.init.normal_(std=0.02) on weights, zero biases (as in the PyTorch module).
    return {
        "w1": 0.02 * jax.random.normal(k1, (input_size, hidden_size), jnp.float32),
        "b1": jnp.zeros((1, hidden_size), jnp.float32),
        "w2": 0.02 * jax.random.normal(k2, (hidden_size, hidden_size), jnp.float32),
        "b2": jnp.zeros((1, hidden_size), jnp.float32),
        "w3": 0.02 * jax.random.normal(k3, (hidden_size, 1), jnp.float32),
        "b3": jnp.zeros((1, 1), jnp.float32),
    }


def reference_forward(x, p):
    h = jax.nn.elu(x @ p["w1"] + p["b1"])
    h = jax.nn.elu(h @ p["w2"] + p["b2"])
    return h @ p["w3"] + p["b3"]


if __name__ == "__main__":
    key = jax.random.PRNGKey(0)
    kx, kp = jax.random.split(key)

    B, INPUT_SIZE, HIDDEN = 16, 2, 128
    x = jax.random.normal(kx, (B, INPUT_SIZE), jnp.float32)
    params = init_params(kp, INPUT_SIZE, HIDDEN)

    out = mine_forward(x, params)
    out = jax.block_until_ready(out)

    ref = reference_forward(x, params)
    assert out.shape == (B, 1), out.shape
    assert jnp.allclose(out, ref, atol=1e-5, rtol=1e-5), "mismatch vs reference"

    print("KERNEL_OK")
</pallas_src>

<mosaic_0001>
module attributes {stable_mosaic.version = 11 : i64} {
  func.func @mine_kernel(%arg0: i32, %arg1: memref<256x2xf32, #tpu.memory_space<vmem>>, %arg2: memref<2x128xf32, #tpu.memory_space<vmem>>, %arg3: memref<1x128xf32, #tpu.memory_space<vmem>>, %arg4: memref<128x128xf32, #tpu.memory_space<vmem>>, %arg5: memref<1x128xf32, #tpu.memory_space<vmem>>, %arg6: memref<1x128xf32, #tpu.memory_space<vmem>>, %arg7: memref<1x1xf32, #tpu.memory_space<smem>>, %arg8: memref<1x256xf32, #tpu.memory_space<vmem>>) attributes {dimension_semantics = [#tpu.dimension_semantics<parallel>], iteration_bounds = array<i64: 1>, scalar_prefetch = 0 : i64, scratch_operands = 0 : i64, tpu.core_type = #tpu.core_type<tc>, window_params = [{transform_indices = @transform_0, window_bounds = array<i64: 256, 2>}, {pipeline_mode = #tpu.pipeline_mode<synchronous>, transform_indices = @transform_1, window_bounds = array<i64: 2, 128>}, {pipeline_mode = #tpu.pipeline_mode<synchronous>, transform_indices = @transform_2, window_bounds = array<i64: 1, 128>}, {pipeline_mode = #tpu.pipeline_mode<synchronous>, transform_indices = @transform_3, window_bounds = array<i64: 128, 128>}, {pipeline_mode = #tpu.pipeline_mode<synchronous>, transform_indices = @transform_4, window_bounds = array<i64: 1, 128>}, {pipeline_mode = #tpu.pipeline_mode<synchronous>, transform_indices = @transform_5, window_bounds = array<i64: 1, 128>}, {transform_indices = @transform_6, window_bounds = array<i64: 1, 1>}, {transform_indices = @transform_7, window_bounds = array<i64: 1, 256>}]} {
    %c0 = arith.constant 0 : index
    %c0_0 = arith.constant 0 : index
    %0 = vector.load %arg1[%c0, %c0_0] : memref<256x2xf32, #tpu.memory_space<vmem>>, vector<256x2xf32>
    %1 = vector.extract_strided_slice %0 {offsets = [0, 0], sizes = [256, 1], strides = [1, 1]} : vector<256x2xf32> to vector<256x1xf32>
    %c0_1 = arith.constant 0 : index
    %c0_2 = arith.constant 0 : index
    %2 = vector.load %arg2[%c0_1, %c0_2] : memref<2x128xf32, #tpu.memory_space<vmem>>, vector<1x128xf32>
    %3 = vector.broadcast %1 : vector<256x1xf32> to vector<256x128xf32>
    %4 = vector.broadcast %2 : vector<1x128xf32> to vector<256x128xf32>
    %5 = arith.mulf %3, %4 : vector<256x128xf32>
    %6 = vector.extract_strided_slice %0 {offsets = [0, 1], sizes = [256, 1], strides = [1, 1]} : vector<256x2xf32> to vector<256x1xf32>
    %c1 = arith.constant 1 : index
    %c0_3 = arith.constant 0 : index
    %7 = vector.load %arg2[%c1, %c0_3] : memref<2x128xf32, #tpu.memory_space<vmem>>, vector<1x128xf32>
    %8 = vector.broadcast %6 : vector<256x1xf32> to vector<256x128xf32>
    %9 = vector.broadcast %7 : vector<1x128xf32> to vector<256x128xf32>
    %10 = arith.mulf %8, %9 : vector<256x128xf32>
    %11 = arith.addf %5, %10 : vector<256x128xf32>
    %c0_4 = arith.constant 0 : index
    %c0_5 = arith.constant 0 : index
    %12 = vector.load %arg3[%c0_4, %c0_5] : memref<1x128xf32, #tpu.memory_space<vmem>>, vector<1x128xf32>
    %13 = vector.broadcast %12 : vector<1x128xf32> to vector<256x128xf32>
    %14 = arith.addf %11, %13 : vector<256x128xf32>
    %cst = arith.constant 0.000000e+00 : f32
    %15 = vector.broadcast %cst : f32 to vector<256x128xf32>
    %16 = arith.cmpf ogt, %14, %15 : vector<256x128xf32>
    %cst_6 = arith.constant 0.000000e+00 : f32
    %17 = vector.broadcast %cst_6 : f32 to vector<256x128xf32>
    %18 = arith.minimumf %14, %17 : vector<256x128xf32>
    %19 = math.exp %18 : vector<256x128xf32>
    %cst_7 = arith.constant 1.000000e+00 : f32
    %20 = vector.broadcast %cst_7 : f32 to vector<256x128xf32>
    %21 = arith.subf %19, %20 : vector<256x128xf32>
    %22 = arith.select %16, %14, %21 : vector<256x128xi1>, vector<256x128xf32>
    %c0_8 = arith.constant 0 : index
    %c0_9 = arith.constant 0 : index
    %23 = vector.load %arg4[%c0_8, %c0_9] : memref<128x128xf32, #tpu.memory_space<vmem>>, vector<128x128xf32>
    %cst_10 = arith.constant dense<0.000000e+00> : vector<256x128xf32>
    %24 = tpu.matmul %22, %23, %cst_10 {dimension_numbers = #tpu.dot_dimension_numbers<[1], [0], [0], [1], [0, 0, 1, 1], [], []>} : vector<256x128xf32>, vector<128x128xf32>, vector<256x128xf32> -> vector<256x128xf32>
    %c0_11 = arith.constant 0 : index
    %c0_12 = arith.constant 0 : index
    %25 = vector.load %arg5[%c0_11, %c0_12] : memref<1x128xf32, #tpu.memory_space<vmem>>, vector<1x128xf32>
    %26 = vector.broadcast %25 : vector<1x128xf32> to vector<256x128xf32>
    %27 = arith.addf %24, %26 : vector<256x128xf32>
    %cst_13 = arith.constant 0.000000e+00 : f32
    %28 = vector.broadcast %cst_13 : f32 to vector<256x128xf32>
    %29 = arith.cmpf ogt, %27, %28 : vector<256x128xf32>
    %cst_14 = arith.constant 0.000000e+00 : f32
    %30 = vector.broadcast %cst_14 : f32 to vector<256x128xf32>
    %31 = arith.minimumf %27, %30 : vector<256x128xf32>
    %32 = math.exp %31 : vector<256x128xf32>
    %cst_15 = arith.constant 1.000000e+00 : f32
    %33 = vector.broadcast %cst_15 : f32 to vector<256x128xf32>
    %34 = arith.subf %32, %33 : vector<256x128xf32>
    %35 = arith.select %29, %27, %34 : vector<256x128xi1>, vector<256x128xf32>
    %c0_16 = arith.constant 0 : index
    %c0_17 = arith.constant 0 : index
    %36 = vector.load %arg6[%c0_16, %c0_17] : memref<1x128xf32, #tpu.memory_space<vmem>>, vector<1x128xf32>
    %cst_18 = arith.constant dense<0.000000e+00> : vector<1x256xf32>
    %37 = tpu.matmul %36, %35, %cst_18 {dimension_numbers = #tpu.dot_dimension_numbers<[1], [1], [0], [0], [0, 0, 1, 0], [], []>} : vector<1x128xf32>, vector<256x128xf32>, vector<1x256xf32> -> vector<1x256xf32>
    %c0_19 = arith.constant 0 : index
    %c0_20 = arith.constant 0 : index
    %38 = memref.load %arg7[%c0_19, %c0_20] : memref<1x1xf32, #tpu.memory_space<smem>>
    %39 = vector.broadcast %38 : f32 to vector<1x256xf32>
    %40 = arith.addf %37, %39 : vector<1x256xf32>
    %c0_21 = arith.constant 0 : index
    %c0_22 = arith.constant 0 : index
    %41 = vector.load %arg8[%c0_21, %c0_22] : memref<1x256xf32, #tpu.memory_space<vmem>>, vector<1x256xf32>
    tpu.vector_store %arg8[%c0_21, %c0_22], %40 {strides = array<i32>} : memref<1x256xf32, #tpu.memory_space<vmem>>, vector<1x256xf32>,
    return
  }
  func.func @transform_0(%arg0: i32) -> (i32, i32) {
    %c0_i32 = arith.constant 0 : i32
    %c0_i32_0 = arith.constant 0 : i32
    return %arg0, %c0_i32 : i32, i32
  }
  func.func @transform_1(%arg0: i32) -> (i32, i32) {
    %c0_i32 = arith.constant 0 : i32
    %c0_i32_0 = arith.constant 0 : i32
    %c0_i32_1 = arith.constant 0 : i32
    return %c0_i32, %c0_i32_0 : i32, i32
  }
  func.func @transform_2(%arg0: i32) -> (i32, i32) {
    %c0_i32 = arith.constant 0 : i32
    %c0_i32_0 = arith.constant 0 : i32
    %c0_i32_1 = arith.constant 0 : i32
    return %c0_i32, %c0_i32_0 : i32, i32
  }
  func.func @transform_3(%arg0: i32) -> (i32, i32) {
    %c0_i32 = arith.constant 0 : i32
    %c0_i32_0 = arith.constant 0 : i32
    %c0_i32_1 = arith.constant 0 : i32
    return %c0_i32, %c0_i32_0 : i32, i32
  }
  func.func @transform_4(%arg0: i32) -> (i32, i32) {
    %c0_i32 = arith.constant 0 : i32
    %c0_i32_0 = arith.constant 0 : i32
    %c0_i32_1 = arith.constant 0 : i32
    return %c0_i32, %c0_i32_0 : i32, i32
  }
  func.func @transform_5(%arg0: i32) -> (i32, i32) {
    %c0_i32 = arith.constant 0 : i32
    %c0_i32_0 = arith.constant 0 : i32
    %c0_i32_1 = arith.constant 0 : i32
    return %c0_i32, %c0_i32_0 : i32, i32
  }
  func.func @transform_6(%arg0: i32) -> (i32, i32) {
    %c0_i32 = arith.constant 0 : i32
    %c0_i32_0 = arith.constant 0 : i32
    %c0_i32_1 = arith.constant 0 : i32
    return %c0_i32, %c0_i32_0 : i32, i32
  }
  func.func @transform_7(%arg0: i32) -> (i32, i32) {
    %c0_i32 = arith.constant 0 : i32
    %c0_i32_0 = arith.constant 0 : i32
    return %c0_i32, %arg0 : i32, i32
  }
}

</mosaic_0001>

<bundles_post_ra>
// kernel: tpu_custom_call.1
= control target key start
LH: loop header
LB: loop body
LE: loop exit
PB: predicated region body
PF: predicated region fallthrough
CT: control target
= control target key end

     0   :  { %v1378_v3 = vmov 1   ;;  %v1379_v4 = vmov 0   ;;  %s2034_s0 = inlined_call_operand.vmem [shape: f32[256,2], index: 0, kind: input, shape index: {}]   ;;  %s2035_s1 = inlined_call_operand.vmem [shape: f32[2,128], index: 1, kind: input, shape index: {}]   ;;  %s2036_s2 = inlined_call_operand.vmem [shape: f32[1,128], index: 2, kind: input, shape index: {}]   ;;  %s2037_s3 = inlined_call_operand.vmem [shape: f32[128,128], index: 3, kind: input, shape index: {}]   ;;  %s2038_s4 = inlined_call_operand.vmem [shape: f32[1,128], index: 4, kind: input, shape index: {}]   ;;  %s2039_s5 = inlined_call_operand.vmem [shape: f32[1,128], index: 5, kind: input, shape index: {}]   ;;  %s2040_s6 = inlined_call_operand.<no memory space> [shape: f32[1,1], index: 6, kind: input, shape index: {}]   ;;  %s2041_s7 = inlined_call_operand.hbm [shape: f32[1,256], index: 7, kind: output, shape index: {}]  }
   0x1   :  { %v52_v0 = vld [vmem:[%s2034_s0 + $0xc0] sm:$0xff]  ;;  %v51_v1 = vld [vmem:[%s2034_s0 + $0xb8] sm:$0xff]  ;;  %v50_v2 = vld [vmem:[%s2034_s0 + $0xb0] sm:$0xff]  ;;  %1186 = vset.pattern.permute.xlu0 %v1378_v3  ;;  %1190 = vset.pattern.permute.xlu2 %v1379_v4 }
   0x2   :  { %1188 = vset.pattern.permute.xlu1 %v1379_v4  ;;  %183 = vperm.xlu2 %1190, %v52_v0  }
   0x3   :  { %178 = vperm.xlu1 %1188, %v51_v1   ;;  %344 = vperm.xlu0 %1186, %v50_v2  }
   0x4   :  { %13 = vsyncpa [#allocation4], 0  ;;  %v53_v5 = vld [vmem:[%s2034_s0 + $0xc8] sm:$0xff]  ;;  %v28_v6 = vld [vmem:[%s2034_s0] sm:$0xff]  ;;  %s1380_s11 = smov [#allocation3]   ;;  %s1062_s14 = sshll.u32 %s2041_s7, 4  ;;  %s1063_s14 = int_to_ptr.hbm [resolvable:$true] %s1062_s14 }
   0x5   :  { %v56_v7 = vld [vmem:[%s2034_s0 + $0xe0] sm:$0xff]  ;;  %v54_v8 = vld [vmem:[%s2034_s0 + $0xd0] sm:$0xff]  ;;  %v29_v10 = vld [vmem:[%s2034_s0 + $0x8] sm:$0xff]  ;;  %s1060_s12 = sshll.u32 %s1380_s11, 4  ;;  %s1061_s12 = int_to_ptr.vmem [resolvable:$true] %s1060_s12 }
   0x6   :  { %v1454_v9 = vld [vmem:[%s2034_s0 + $0x60] sm:$0xff]  ;;  %v55_v11 = vld [vmem:[%s2034_s0 + $0xd8] sm:$0xff]  ;;  %v30_v13 = vld [vmem:[%s2034_s0 + $0x10] sm:$0xff] }
   0x7   :  { %v39_v12 = vld [vmem:[%s2034_s0 + $0x58] sm:$0xff]  ;;  %v1475_v14 = vld [vmem:[%s2034_s0 + $0x28] sm:$0xff]  ;;  %v32_v19 = vld [vmem:[%s2034_s0 + $0x20] sm:$0xff] }
   0x8   :  { %v31_v15 = vld [vmem:[%s2034_s0 + $0x18] sm:$0xff]  ;;  %v57_v16 = vld [vmem:[%s2034_s0 + $0xe8] sm:$0xff]  ;;  %v690_v20 = vld [vmem:[%s2037_s3 + $0x70] sm:$0xff] }
   0x9   :  { %v1491_v17 = vld [vmem:[%s2034_s0 + $0x38] sm:$0xff]  ;;  %v689_v21 = vld [vmem:[%s2037_s3 + $0x68] sm:$0xff]  ;;  %v688_v22 = vld [vmem:[%s2037_s3 + $0x60] sm:$0xff] }
   0xa   :  { %1191 = vset.pattern.permute.xlu2 %v1378_v3  ;;  %v691_v18 = vld [vmem:[%s2037_s3 + $0x78] sm:$0xff]  ;;  %v1517_v25 = vld [vmem:[%s2037_s3 + $0x50] sm:$0xff]  ;;  %v1529_v27 = vld [vmem:[%s2037_s3 + $0x48] sm:$0xff] }
   0xb   :  { %1189 = vset.pattern.permute.xlu1 %v1378_v3  ;;  %1187 = vset.pattern.permute.xlu0 %v1379_v4  ;;  %v687_v24 = vld [vmem:[%s2037_s3 + $0x58] sm:$0xff]  ;;  %v58_v26 = vld [vmem:[%s2034_s0 + $0xf0] sm:$0xff]  ;;  %v684_v28 = vld [vmem:[%s2037_s3 + $0x40] sm:$0xff] }
   0xc   :  { %352 = vperm.xlu2 %1191, %v52_v0   ;;  %348 = vperm.xlu1 %1189, %v51_v1   ;;  %v683_v29 = vld [vmem:[%s2037_s3 + $0x38] sm:$0xff]  ;;  %v1545_v30 = vld [vmem:[%s2034_s0 + $0x30] sm:$0xff]  ;;  %v681_v33 = vld [vmem:[%s2037_s3 + $0x28] sm:$0xff] }
   0xd   :  { %173 = vperm.xlu0 %1187, %v50_v2   ;;  %1137 = vmatpush.msra.mxu3 %v691_v18  ;;  %v682_v31 = vld [vmem:[%s2037_s3 + $0x30] sm:$0xff]  ;;  %v1561_v34 = vld [vmem:[%s2037_s3 + $0x20] sm:$0xff]  ;;  %v1567_v35 = vld [vmem:[%s2037_s3 + $0x18] sm:$0xff] }
   0xe   :  { %696 = vmatpush.msra.mxu0 %v691_v18  ;;  %1135 = vmatpush.msra.mxu1 %v691_v18  ;;  %v1574_v36 = vld [vmem:[%s2037_s3 + $0x10] sm:$0xff]  ;;  %v41_v38 = vld [vmem:[%s2034_s0 + $0x68] sm:$0xff]  ;;  %v1593_v40 = vld [vmem:[%s2037_s3] sm:$0xff] }
   0xf   :  { %1136 = vmatpush.msra.mxu2 %v691_v18  ;;  %1140 = vmatpush.msra.mxu3 %v690_v20  ;;  %v677_v39 = vld [vmem:[%s2037_s3 + $0x8] sm:$0xff]  ;;  %v1603_v43 = vld [vmem:[%s2034_s0 + $0x98] sm:$0xff]  ;;  %v1616_v46 = vld [vmem:[%s2035_s1 + $0x1] ss:$0 sm:$0xff] }
  0x10   :  { %697 = vmatpush.msra.mxu0 %v690_v20  ;;  %1138 = vmatpush.msra.mxu1 %v690_v20  ;;  %v59_v44 = vld [vmem:[%s2034_s0 + $0xf8] sm:$0xff]  ;;  %v1621_v47 = vld [vmem:[%s2035_s1] ss:$0 sm:$0xff]  ;;  %v42_v55 = vld [vmem:[%s2034_s0 + $0x70] sm:$0xff] }
  0x11   :  { %1143 = vmatpush.msra.mxu3 %v689_v21  ;;  %1139 = vmatpush.msra.mxu2 %v690_v20  ;;  %v1636_v56 = vld [vmem:[%s2034_s0 + $0xa0] sm:$0xff] }
  0x12   :  { %698 = vmatpush.msra.mxu0 %v689_v21  ;;  %1141 = vmatpush.msra.mxu1 %v689_v21  ;;  %v1643_v58 = vld [vmem:[%s2036_s2] ss:$0 sm:$0xff] }
  0x13   :  { %1146 = vmatpush.msra.mxu3 %v688_v22  ;;  %1142 = vmatpush.msra.mxu2 %v689_v21 }
  0x14   :  { %356 = vperm.xlu2 %1191, %v53_v5   ;;  %1192 = vset.pattern.permute.xlu1 %v1379_v4 }
  0x15   :  { %63 = vperm.xlu0 %1187, %v28_v6   ;;  %188 = vperm.xlu1 %1192, %v53_v5  }
  0x16   :  { %699 = vmatpush.msra.mxu0 %v688_v22  ;;  %1144 = vmatpush.msra.mxu1 %v688_v22 }
  0x17   :  { %1149 = vmatpush.msra.mxu3 %v687_v24  ;;  %1145 = vmatpush.msra.mxu2 %v688_v22 }
  0x18   :  { %700 = vmatpush.msra.mxu0 %v687_v24  ;;  %1147 = vmatpush.msra.mxu1 %v687_v24 }
  0x19   :  { %1152 = vmatpush.msra.mxu3 %v1517_v25  ;;  %1148 = vmatpush.msra.mxu2 %v687_v24 }
  0x1a   :  { %701 = vmatpush.msra.mxu0 %v1517_v25  ;;  %1150 = vmatpush.msra.mxu1 %v1517_v25 }
  0x1b   :  { %1155 = vmatpush.msra.mxu3 %v1529_v27  ;;  %1151 = vmatpush.msra.mxu2 %v1517_v25  ;;  %v43_v25 = vld [vmem:[%s2034_s0 + $0x78] sm:$0xff] }
  0x1c   :  { %1194 = vset.pattern.permute.xlu2 %v1379_v4  ;;  %702 = vmatpush.msra.mxu0 %v1529_v27 }
  0x1d   :  { %203 = vperm.xlu0 %1187, %v56_v7   ;;  %193 = vperm.xlu2 %1194, %v54_v8  }
  0x1e   :  { %1193 = vset.pattern.permute.xlu1 %v1378_v3  ;;  %1158 = vmatpush.msra.mxu3 %v684_v28 }
  0x1f   :  { %256 = vperm.xlu1 %1193, %v28_v6   ;;  %703 = vmatpush.msra.mxu0 %v684_v28 }
  0x20   :  { %1153 = vmatpush.msra.mxu1 %v1529_v27  ;;  %1161 = vmatpush.msra.mxu3 %v683_v29 }
  0x21   :  { %704 = vmatpush.msra.mxu0 %v683_v29  ;;  %1154 = vmatpush.msra.mxu2 %v1529_v27 }
  0x22   :  { %1156 = vmatpush.msra.mxu1 %v684_v28  ;;  %1164 = vmatpush.msra.mxu3 %v682_v31 }
  0x23   :  { %705 = vmatpush.msra.mxu0 %v682_v31  ;;  %1157 = vmatpush.msra.mxu2 %v684_v28 }
  0x24   :  { %1159 = vmatpush.msra.mxu1 %v683_v29  ;;  %1167 = vmatpush.msra.mxu3 %v681_v33 }
  0x25   :  { %123 = vperm.xlu0 %1187, %v1454_v9   ;;  %68 = vperm.xlu2 %1194, %v29_v10  }
  0x26   :  { %706 = vmatpush.msra.mxu0 %v681_v33  ;;  %1162 = vmatpush.msra.mxu1 %v682_v31 }
  0x27   :  { %360 = vperm.xlu1 %1193, %v54_v8   ;;  %1170 = vmatpush.msra.mxu3 %v1561_v34 }
  0x28   :  { %707 = vmatpush.msra.mxu0 %v1561_v34  ;;  %1165 = vmatpush.msra.mxu1 %v681_v33 }
  0x29   :  { %1173 = vmatpush.msra.mxu3 %v1567_v35  ;;  %1160 = vmatpush.msra.mxu2 %v683_v29 }
  0x2a   :  { %708 = vmatpush.msra.mxu0 %v1567_v35  ;;  %1168 = vmatpush.msra.mxu1 %v1561_v34 }
  0x2b   :  { %1176 = vmatpush.msra.mxu3 %v1574_v36  ;;  %1163 = vmatpush.msra.mxu2 %v682_v31 }
  0x2c   :  { %709 = vmatpush.msra.mxu0 %v1574_v36  ;;  %1171 = vmatpush.msra.mxu1 %v1567_v35 }
  0x2d   :  { %1201 = vset.pattern.permute.xlu0 %v1378_v3  ;;  %1196 = vset.pattern.permute.xlu2 %v1378_v3 }
  0x2e   :  { %260 = vperm.xlu0 %1201, %v29_v10   ;;  %364 = vperm.xlu2 %1196, %v55_v11  }
  0x2f   :  { %1195 = vset.pattern.permute.xlu1 %v1379_v4  ;;  %1179 = vmatpush.msra.mxu3 %v677_v39 }
  0x30   :  { %198 = vperm.xlu1 %1195, %v55_v11   ;;  %710 = vmatpush.msra.mxu0 %v677_v39 }
  0x31   :  { %1182 = vmatpush.msra.mxu3 %v1593_v40  ;;  %1174 = vmatpush.msra.mxu1 %v1574_v36 }
  0x32   :  { %711 = vmatpush.msra.mxu0 %v1593_v40  ;;  %1166 = vmatpush.msra.mxu2 %v681_v33 }
  0x33   :  { %1177 = vmatpush.msra.mxu1 %v677_v39 }
  0x34   :  { %1169 = vmatpush.msra.mxu2 %v1561_v34 }
  0x35   :  { %1180 = vmatpush.msra.mxu1 %v1593_v40 }
  0x36   :  { %300 = vperm.xlu0 %1201, %v39_v12   ;;  %264 = vperm.xlu2 %1196, %v30_v13  }
  0x37   :  { %1172 = vmatpush.msra.mxu2 %v1567_v35 }
  0x38   :  { %73 = vperm.xlu1 %1195, %v30_v13  }
  0x39   :  { %1175 = vmatpush.msra.mxu2 %v1574_v36 }
  0x3b   :  { %1178 = vmatpush.msra.mxu2 %v677_v39 }
  0x3d   :  { %1181 = vmatpush.msra.mxu2 %v1593_v40  ;;  %v36_v40 = vld [vmem:[%s2034_s0 + $0x40] sm:$0xff] }
  0x3e   :  { %1198 = vset.pattern.permute.xlu2 %v1379_v4  ;;  %276 = vperm.xlu0 %1201, %v1475_v14  }
  0x3f   :  { %78 = vperm.xlu2 %1198, %v31_v15  }
  0x40   :  { %1197 = vset.pattern.permute.xlu1 %v1378_v3 }
  0x41   :  { %368 = vperm.xlu1 %1197, %v56_v7  }
  0x46   :  { %284 = vperm.xlu0 %1201, %v1491_v17  }
  0x47   :  { %118 = vperm.xlu2 %1198, %v39_v12  }
  0x49   :  { %268 = vperm.xlu1 %1197, %v31_v15  }
  0x4e   :  { %1208 = vset.pattern.permute.xlu0 %v1379_v4 }
  0x4f   :  { %1200 = vset.pattern.permute.xlu2 %v1378_v3  ;;  %93 = vperm.xlu0 %1208, %v1545_v30  }
  0x50   :  { %372 = vperm.xlu2 %1200, %v57_v16  }
  0x51   :  { %1199 = vset.pattern.permute.xlu1 %v1379_v4 }
  0x52   :  { %208 = vperm.xlu1 %1199, %v57_v16  }
  0x57   :  { %158 = vperm.xlu0 %1208, %v1603_v43  }
  0x58   :  { %272 = vperm.xlu2 %1200, %v32_v19  }
  0x5a   :  { %83 = vperm.xlu1 %1199, %v32_v19  }
  0x5c   :  { %v1509_v23 = vpop.permute.xlu2 %183 }
  0x5d   :  { %v246_v57 = vmul.f32 %v1621_v47, %v1509_v23 }
  0x5f   :  { %1213 = vset.pattern.permute.xlu0 %v1378_v3 }
  0x60   :  { %1203 = vset.pattern.permute.xlu2 %v1379_v4  ;;  %336 = vperm.xlu0 %1213, %v1636_v56  }
  0x61   :  { %213 = vperm.xlu2 %1203, %v58_v26  }
  0x62   :  { %1202 = vset.pattern.permute.xlu1 %v1378_v3 }
  0x63   :  { %304 = vperm.xlu1 %1202, %v1454_v9  }
  0x66   :  { %v1552_v32 = vpop.permute.xlu2 %352 }
  0x67   :  { %v408_v59 = vmul.f32 %v1616_v46, %v1552_v32 }
  0x68   :  { %1216 = vset.pattern.permute.xlu0 %v1379_v4 }
  0x69   :  { %88 = vperm.xlu2 %1203, %v1475_v14   ;;  %v440_v0 = vadd.f32 %v408_v59, %v246_v57 }
  0x6b   :  { %376 = vperm.xlu1 %1202, %v58_v26   ;;  %v1659_v9 = vadd.f32 %v1643_v58, %v440_v0 }
  0x6d   :  { %v540_v14 = vmin.f32 %v1659_v9, 0.0  ;;  %vm508_vm2 = vcmp.gt.f32.partialorder %v1659_v9, 0.0 }
  0x6e   :  { %v1576_v37 = vpop.permute.xlu2 %356 }
  0x6f   :  { %v409_v10 = vmul.f32 %v1616_v46, %v1576_v37  ;;  %v596_v23 = vmul.f32 1.442695, %v540_v14 }
  0x71   :  { %1205 = vset.pattern.permute.xlu2 %v1378_v3 }
  0x72   :  { %308 = vperm.xlu2 %1205, %v41_v38  }
  0x73   :  { %1204 = vset.pattern.permute.xlu1 %v1379_v4 }
  0x74   :  { %128 = vperm.xlu1 %1204, %v41_v38  }
  0x75   :  { %v179_v41 = vpop.permute.xlu1 %178  ;;  %v345_v42 = vpop.permute.xlu0 %344 }
  0x76   :  { %v406_v48 = vmul.f32 %v1616_v46, %v345_v42  ;;  %v245_v50 = vmul.f32 %v1621_v47, %v179_v41  ;;  %v1697_v41 = vld [vmem:[%s2034_s0 + $0x80] sm:$0xff] }
  0x77   :  { %v1608_v45 = vpop.permute.xlu2 %193  ;;  %143 = vperm.xlu0 %1216, %v1697_v41  }
  0x78   :  { %v248_v32 = vmul.f32 %v1621_v47, %v1608_v45 }
  0x7a   :  { %380 = vperm.xlu2 %1205, %v59_v44  }
  0x7c   :  { %218 = vperm.xlu1 %1204, %v59_v44  }
  0x7e   :  { %v349_v49 = vpop.permute.xlu1 %348 }
  0x7f   :  { %v407_v51 = vmul.f32 %v1616_v46, %v349_v49  ;;  %v174_v52 = vpop.permute.xlu0 %173  ;;  %v1626_v53 = vpop.permute.xlu2 %68  ;;  %1219 = vset.pattern.permute.xlu0 %v1378_v3 }
  0x80   :  { %v244_v54 = vmul.f32 %v1621_v47, %v174_v52 }
  0x81   :  { %v439_v60 = vadd.f32 %v407_v51, %v245_v50  ;;  %v223_v51 = vmul.f32 %v1621_v47, %v1626_v53  ;;  %v37_v53 = vld [vmem:[%s2034_s0 + $0x48] sm:$0xff] }
  0x82   :  { %v438_v61 = vadd.f32 %v406_v48, %v244_v54  ;;  %1207 = vset.pattern.permute.xlu2 %v1379_v4 }
  0x83   :  { %v475_v62 = vadd.f32 %v1643_v58, %v439_v60  ;;  %133 = vperm.xlu2 %1207, %v42_v55  }
  0x84   :  { %v474_v63 = vadd.f32 %v1643_v58, %v438_v61  ;;  %1206 = vset.pattern.permute.xlu1 %v1378_v3 }
  0x85   :  { %280 = vperm.xlu1 %1206, %v1545_v30   ;;  %v539_v2 = vmin.f32 %v475_v62, 0.0  ;;  %vm507_vm1 = vcmp.gt.f32.partialorder %v475_v62, 0.0 }
  0x86   :  { %v538_v1 = vmin.f32 %v474_v63, 0.0  ;;  %vm506_vm0 = vcmp.gt.f32.partialorder %v474_v63, 0.0 }
  0x87   :  { %v189_v5 = vpop.permute.xlu1 %188  ;;  %v64_v6 = vpop.permute.xlu0 %63  ;;  %v594_v12 = vmul.f32 1.442695, %v539_v2  ;;  %v1719_v2 = vld [vmem:[%s2034_s0 + $0x90] sm:$0xff] }
  0x88   :  { %v1656_v7 = vpop.permute.xlu2 %364  ;;  %v592_v8 = vmul.f32 1.442695, %v538_v1  ;;  %v247_v11 = vmul.f32 %v1621_v47, %v189_v5  ;;  %v222_v18 = vmul.f32 %v1621_v47, %v64_v6  ;;  %328 = vperm.xlu0 %1219, %v1719_v2  }
  0x89   :  { %v411_v52 = vmul.f32 %v1616_v46, %v1656_v7 }
  0x8a   :  { %1224 = vpow2.f32 %v592_v8  ;;  %v441_v13 = vadd.f32 %v409_v10, %v247_v11 }
  0x8b   :  { %98 = vperm.xlu2 %1207, %v1491_v17   ;;  %1226 = vpow2.f32 %v594_v12 }
  0x8c   :  { %v1674_v22 = vadd.f32 %v1643_v58, %v441_v13  ;;  %1228 = vpow2.f32 %v596_v23 }
  0x8d   :  { %312 = vperm.xlu1 %1206, %v42_v55  }
  0x8e   :  { %v541_v29 = vmin.f32 %v1674_v22, 0.0  ;;  %vm509_vm4 = vcmp.gt.f32.partialorder %v1674_v22, 0.0 }
  0x8f   :  { %v1668_v15 = vpop.permute.xlu0 %203 }
  0x90   :  { %v1225_v16 = vpop.eup %1224  ;;  %v1671_v19 = vpop.permute.xlu2 %264  ;;  %v598_v38 = vmul.f32 1.442695, %v541_v29 }
  0x91   :  { %v257_v20 = vpop.permute.xlu1 %256  ;;  %v1093_v21 = vadd.f32 -1.0, %v1225_v16  ;;  %v1227_v26 = vpop.eup %1226  ;;  %v386_v13 = vmul.f32 %v1616_v46, %v1671_v19 }
  0x92   :  { %v384_v17 = vmul.f32 %v1616_v46, %v257_v20  ;;  %v1094_v31 = vadd.f32 -1.0, %v1227_v26  ;;  %v1229_v42 = vpop.eup %1228 }
  0x93   :  { %v666_v24 = vsel %vm506_vm0, %v474_v63, %v1093_v21  ;;  %1210 = vset.pattern.permute.xlu2 %v1378_v3  ;;  %v1095_v48 = vadd.f32 -1.0, %v1229_v42 }
  0x94   :  { %v416_v27 = vadd.f32 %v384_v17, %v222_v18  ;;  %778 = vmatmul.f32.vlgmr.msra.gmra.mxu3 %v666_v24  ;;  %316 = vperm.xlu2 %1210, %v43_v25   ;;  %v667_v39 = vsel %vm507_vm1, %v475_v62, %v1094_v31 }
  0x95   :  { %1209 = vset.pattern.permute.xlu1 %v1379_v4  ;;  %v668_v63 = vsel %vm508_vm2, %v1659_v9, %v1095_v48 }
  0x96   :  { %v452_v28 = vadd.f32 %v1643_v58, %v416_v27  ;;  %138 = vperm.xlu1 %1209, %v43_v25  }
  0x97   :  { %v1684_v30 = vpop.permute.xlu0 %123 }
  0x98   :  { %v516_v33 = vmin.f32 %v452_v28, 0.0  ;;  %vm484_vm3 = vcmp.gt.f32.partialorder %v452_v28, 0.0 }
  0x99   :  { %v361_v34 = vpop.permute.xlu1 %360  ;;  %v1688_v35 = vpop.permute.xlu2 %78 }
  0x9a   :  { %v410_v36 = vmul.f32 %v1616_v46, %v361_v34  ;;  %v548_v37 = vmul.f32 1.442695, %v516_v33 }
  0x9c   :  { %v442_v44 = vadd.f32 %v410_v36, %v248_v32  ;;  %781 = vmatmul.f32.gmra.mxu3 %v667_v39  ;;  %1230 = vpow2.f32 %v548_v37  ;;  %288 = vperm.xlu2 %1210, %v36_v40  }
  0x9d   :  { %1232 = vpow2.f32 %v598_v38 }
  0x9e   :  { %v1701_v45 = vadd.f32 %v1643_v58, %v442_v44  ;;  %103 = vperm.xlu1 %1209, %v36_v40  }
  0xa0   :  { %v261_v49 = vpop.permute.xlu0 %260  ;;  %v542_v50 = vmin.f32 %v1701_v45, 0.0  ;;  %vm510_vm5 = vcmp.gt.f32.partialorder %v1701_v45, 0.0 }
  0xa1   :  { %v385_v54 = vmul.f32 %v1616_v46, %v261_v49  ;;  %v119_v55 = vpop.permute.xlu2 %118 }
  0xa2   :  { %v1231_v57 = vpop.eup %1230  ;;  %v199_v59 = vpop.permute.xlu1 %198  ;;  %v600_v60 = vmul.f32 1.442695, %v542_v50  ;;  %v233_v9 = vmul.f32 %v1621_v47, %v119_v55  ;;  %v225_v50 = vmul.f32 %v1621_v47, %v1688_v35  ;;  %v49_v35 = vld [vmem:[%s2034_s0 + $0xa8] sm:$0xff] }
  0xa3   :  { %v417_v61 = vadd.f32 %v385_v54, %v223_v51  ;;  %v249_v62 = vmul.f32 %v1621_v47, %v199_v59  ;;  %v1071_v0 = vadd.f32 -1.0, %v1231_v57  ;;  %v1233_v1 = vpop.eup %1232 }
  0xa4   :  { %784 = vmatmul.f32.gmra.mxu3 %v668_v63  ;;  %1212 = vset.pattern.permute.xlu2 %v1379_v4  ;;  %1234 = vpow2.f32 %v600_v60  ;;  %v1096_v10 = vadd.f32 -1.0, %v1233_v1 }
  0xa5   :  { %v453_v5 = vadd.f32 %v1643_v58, %v417_v61  ;;  %v443_v6 = vadd.f32 %v411_v52, %v249_v62  ;;  %v644_v7 = vsel %vm484_vm3, %v452_v28, %v1071_v0  ;;  %108 = vperm.xlu2 %1212, %v37_v53  }
  0xa6   :  { %1211 = vset.pattern.permute.xlu1 %v1378_v3  ;;  %712 = vmatmul.f32.vlgmr.msra.gmra.mxu0 %v644_v7  ;;  %v669_v23 = vsel %vm509_vm4, %v1674_v22, %v1096_v10  ;;  %v250_v22 = vmul.f32 %v1621_v47, %v1668_v15  ;;  %v38_v15 = vld [vmem:[%s2034_s0 + $0x50] sm:$0xff] }
  0xa7   :  { %v1725_v8 = vadd.f32 %v1643_v58, %v443_v6  ;;  %332 = vperm.xlu1 %1211, %v1603_v43   ;;  %v517_v11 = vmin.f32 %v453_v5, 0.0  ;;  %vm485_vm6 = vcmp.gt.f32.partialorder %v453_v5, 0.0 }
  0xa8   :  { %v301_v12 = vpop.permute.xlu0 %300 }
  0xa9   :  { %v395_v14 = vmul.f32 %v1616_v46, %v301_v12  ;;  %v550_v16 = vmul.f32 1.442695, %v517_v11  ;;  %v543_v18 = vmin.f32 %v1725_v8, 0.0  ;;  %vm511_vm8 = vcmp.gt.f32.partialorder %v1725_v8, 0.0 }
  0xaa   :  { %v74_v20 = vpop.permute.xlu1 %73  ;;  %v1735_v21 = vpop.permute.xlu2 %372 }
  0xab   :  { %v427_v17 = vadd.f32 %v395_v14, %v233_v9  ;;  %v224_v43 = vmul.f32 %v1621_v47, %v74_v20  ;;  %v1235_v24 = vpop.eup %1234  ;;  %1236 = vpow2.f32 %v550_v16  ;;  %v602_v25 = vmul.f32 1.442695, %v543_v18  ;;  %v45_v14 = vld [vmem:[%s2034_s0 + $0x88] sm:$0xff] }
  0xac   :  { %787 = vmatmul.f32.gmra.mxu3 %v669_v23  ;;  %v1097_v28 = vadd.f32 -1.0, %v1235_v24  ;;  %v413_v6 = vmul.f32 %v1616_v46, %v1735_v21 }
  0xad   :  { %v463_v19 = vadd.f32 %v1643_v58, %v427_v17  ;;  %v418_v26 = vadd.f32 %v386_v13, %v224_v43  ;;  %163 = vperm.xlu2 %1212, %v1636_v56   ;;  %1238 = vpow2.f32 %v602_v25 }
  0xae   :  { %v670_v37 = vsel %vm510_vm5, %v1701_v45, %v1097_v28 }
  0xaf   :  { %v454_v27 = vadd.f32 %v1643_v58, %v418_v26  ;;  %292 = vperm.xlu1 %1211, %v37_v53   ;;  %v527_v29 = vmin.f32 %v463_v19, 0.0  ;;  %vm495_vm7 = vcmp.gt.f32.partialorder %v463_v19, 0.0 }
  0xb0   :  { %v277_v7 = vpop.permute.xlu0 %276 }
  0xb1   :  { %v570_v31 = vmul.f32 1.442695, %v527_v29  ;;  %v518_v32 = vmin.f32 %v454_v27, 0.0  ;;  %v1237_v33 = vpop.eup %1236  ;;  %vm486_vm9 = vcmp.gt.f32.partialorder %v454_v27, 0.0  ;;  %v389_v20 = vmul.f32 %v1616_v46, %v277_v7 }
  0xb2   :  { %v1745_v34 = vpop.permute.xlu2 %272  ;;  %v1072_v56 = vadd.f32 -1.0, %v1237_v33 }
  0xb3   :  { %v369_v36 = vpop.permute.xlu1 %368  ;;  %1240 = vpow2.f32 %v570_v31  ;;  %v552_v38 = vmul.f32 1.442695, %v518_v32  ;;  %v1239_v39 = vpop.eup %1238  ;;  %v388_v43 = vmul.f32 %v1616_v46, %v1745_v34 }
  0xb4   :  { %v412_v40 = vmul.f32 %v1616_v46, %v369_v36  ;;  %790 = vmatmul.f32.gmra.mxu3 %v670_v37  ;;  %v645_v42 = vsel %vm485_vm6, %v453_v5, %v1072_v56  ;;  %v1098_v45 = vadd.f32 -1.0, %v1239_v39  ;;  %v234_v37 = vmul.f32 %v1621_v47, %v1684_v30 }
  0xb5   :  { %1242 = vpow2.f32 %v552_v38  ;;  %1215 = vset.pattern.permute.xlu2 %v1378_v3  ;;  %715 = vmatmul.f32.gmra.mxu0 %v645_v42 }
  0xb6   :  { %v444_v44 = vadd.f32 %v412_v40, %v250_v22  ;;  %296 = vperm.xlu2 %1215, %v38_v15   ;;  %v671_v57 = vsel %vm511_vm8, %v1725_v8, %v1098_v45 }
  0xb7   :  { %1214 = vset.pattern.permute.xlu1 %v1379_v4 }
  0xb8   :  { %v480_v48 = vadd.f32 %v1643_v58, %v444_v44  ;;  %113 = vperm.xlu1 %1214, %v38_v15  }
  0xb9   :  { %v1241_v49 = vpop.eup %1240 }
  0xba   :  { %v1082_v51 = vadd.f32 -1.0, %v1241_v49  ;;  %v544_v52 = vmin.f32 %v480_v48, 0.0  ;;  %vm512_vm10 = vcmp.gt.f32.partialorder %v480_v48, 0.0 }
  0xbb   :  { %v1243_v54 = vpop.eup %1242  ;;  %v269_v55 = vpop.permute.xlu1 %268 }
  0xbc   :  { %v1759_v59 = vpop.permute.xlu2 %213  ;;  %v387_v60 = vmul.f32 %v1616_v46, %v269_v55  ;;  %793 = vmatmul.f32.gmra.mxu3 %v671_v57  ;;  %v655_v61 = vsel %vm495_vm7, %v463_v19, %v1082_v51  ;;  %v1073_v62 = vadd.f32 -1.0, %v1243_v54  ;;  %v604_v63 = vmul.f32 1.442695, %v544_v52 }
  0xbd   :  { %745 = vmatmul.f32.vlgmr.msra.gmra.mxu1 %v655_v61  ;;  %v252_v44 = vmul.f32 %v1621_v47, %v1759_v59 }
  0xbe   :  { %v419_v0 = vadd.f32 %v387_v60, %v225_v50  ;;  %v646_v1 = vsel %vm486_vm9, %v454_v27, %v1073_v62  ;;  %340 = vperm.xlu2 %1215, %v49_v35   ;;  %1244 = vpow2.f32 %v604_v63 }
  0xbf   :  { %718 = vmatmul.f32.gmra.mxu0 %v646_v1 }
  0xc0   :  { %v455_v53 = vadd.f32 %v1643_v58, %v419_v0  ;;  %168 = vperm.xlu1 %1214, %v49_v35  }
  0xc2   :  { %v519_v5 = vmin.f32 %v455_v53, 0.0  ;;  %vm487_vm11 = vcmp.gt.f32.partialorder %v455_v53, 0.0 }
  0xc4   :  { %v209_v8 = vpop.permute.xlu1 %208  ;;  %v89_v9 = vpop.permute.xlu2 %88  ;;  %v554_v10 = vmul.f32 1.442695, %v519_v5 }
  0xc5   :  { %v1245_v11 = vpop.eup %1244  ;;  %v251_v12 = vmul.f32 %v1621_v47, %v209_v8  ;;  %v227_v18 = vmul.f32 %v1621_v47, %v89_v9  ;;  %v285_v9 = vpop.permute.xlu0 %284 }
  0xc6   :  { %v1099_v13 = vadd.f32 -1.0, %v1245_v11  ;;  %1246 = vpow2.f32 %v554_v10  ;;  %1218 = vset.pattern.permute.xlu2 %v1379_v4 }
  0xc7   :  { %v445_v16 = vadd.f32 %v413_v6, %v251_v12  ;;  %148 = vperm.xlu2 %1218, %v45_v14   ;;  %v421_v23 = vadd.f32 %v389_v20, %v227_v18 }
  0xc8   :  { %1217 = vset.pattern.permute.xlu1 %v1378_v3  ;;  %v672_v21 = vsel %vm512_vm10, %v480_v48, %v1099_v13 }
  0xc9   :  { %v481_v17 = vadd.f32 %v1643_v58, %v445_v16  ;;  %796 = vmatmul.f32.gmra.mxu3 %v672_v21  ;;  %320 = vperm.xlu1 %1217, %v1697_v41   ;;  %v457_v29 = vadd.f32 %v1643_v58, %v421_v23  ;;  %v391_v23 = vmul.f32 %v1616_v46, %v285_v9 }
  0xcb   :  { %v545_v4 = vmin.f32 %v481_v17, 0.0  ;;  %v521_v33 = vmin.f32 %v457_v29, 0.0  ;;  %vm513_vm12 = vcmp.gt.f32.partialorder %v481_v17, 0.0  ;;  %vm489_vm14 = vcmp.gt.f32.partialorder %v457_v29, 0.0 }
  0xcc   :  { %v1247_v24 = vpop.eup %1246  ;;  %v84_v25 = vpop.permute.xlu1 %83 }
  0xcd   :  { %v226_v19 = vmul.f32 %v1621_v47, %v84_v25  ;;  %v1074_v26 = vadd.f32 -1.0, %v1247_v24  ;;  %v606_v27 = vmul.f32 1.442695, %v545_v4  ;;  %v309_v28 = vpop.permute.xlu2 %308  ;;  %v558_v39 = vmul.f32 1.442695, %v521_v33  ;;  %v94_v24 = vpop.permute.xlu0 %93 }
  0xce   :  { %v397_v59 = vmul.f32 %v1616_v46, %v309_v28 }
  0xcf   :  { %v420_v3 = vadd.f32 %v388_v43, %v226_v19  ;;  %v647_v31 = vsel %vm487_vm11, %v455_v53, %v1074_v26  ;;  %1248 = vpow2.f32 %v606_v27  ;;  %153 = vperm.xlu2 %1218, %v1719_v2   ;;  %v228_v27 = vmul.f32 %v1621_v47, %v94_v24 }
  0xd0   :  { %721 = vmatmul.f32.gmra.mxu0 %v647_v31 }
  0xd1   :  { %v456_v41 = vadd.f32 %v1643_v58, %v420_v3  ;;  %324 = vperm.xlu1 %1217, %v45_v14  }
  0xd3   :  { %v520_v32 = vmin.f32 %v456_v41, 0.0  ;;  %vm488_vm13 = vcmp.gt.f32.partialorder %v456_v41, 0.0 }
  0xd5   :  { %v1249_v22 = vpop.eup %1248  ;;  %v305_v34 = vpop.permute.xlu1 %304  ;;  %v556_v36 = vmul.f32 1.442695, %v520_v32 }
  0xd6   :  { %v396_v56 = vmul.f32 %v1616_v46, %v305_v34  ;;  %v1100_v38 = vadd.f32 -1.0, %v1249_v22  ;;  %v381_v2 = vpop.permute.xlu2 %380 }
  0xd7   :  { %1250 = vpow2.f32 %v556_v36  ;;  %v415_v11 = vmul.f32 %v1616_v46, %v381_v2 }
  0xd8   :  { %v428_v40 = vadd.f32 %v396_v56, %v234_v37  ;;  %v673_v42 = vsel %vm513_vm12, %v481_v17, %v1100_v38  ;;  %1252 = vpow2.f32 %v558_v39 }
  0xd9   :  { %799 = vmatmul.f32.gmra.mxu3 %v673_v42 }
  0xda   :  { %v464_v15 = vadd.f32 %v1643_v58, %v428_v40 }
  0xdc   :  { %v528_v45 = vmin.f32 %v464_v15, 0.0  ;;  %vm496_vm15 = vcmp.gt.f32.partialorder %v464_v15, 0.0 }
  0xdd   :  { %v1251_v48 = vpop.eup %1250  ;;  %v377_v49 = vpop.permute.xlu1 %376 }
  0xde   :  { %v414_v30 = vmul.f32 %v1616_v46, %v377_v49  ;;  %v1075_v50 = vadd.f32 -1.0, %v1251_v48  ;;  %v572_v51 = vmul.f32 1.442695, %v528_v45  ;;  %v1253_v55 = vpop.eup %1252  ;;  %v134_v60 = vpop.permute.xlu2 %133 }
  0xdf   :  { %v1076_v61 = vadd.f32 -1.0, %v1253_v55  ;;  %v236_v36 = vmul.f32 %v1621_v47, %v134_v60 }
  0xe0   :  { %v446_v52 = vadd.f32 %v414_v30, %v252_v44  ;;  %v648_v54 = vsel %vm488_vm13, %v456_v41, %v1075_v50  ;;  %1254 = vpow2.f32 %v572_v51  ;;  %v159_v51 = vpop.permute.xlu0 %158 }
  0xe1   :  { %724 = vmatmul.f32.gmra.mxu0 %v648_v54  ;;  %v649_v5 = vsel %vm489_vm14, %v457_v29, %v1076_v61  ;;  %v241_v24 = vmul.f32 %v1621_v47, %v159_v51 }
  0xe2   :  { %v482_v57 = vadd.f32 %v1643_v58, %v446_v52 }
  0xe4   :  { %v546_v62 = vmin.f32 %v482_v57, 0.0  ;;  %vm514_vm0 = vcmp.gt.f32.partialorder %v482_v57, 0.0 }
  0xe6   :  { %v1255_v35 = vpop.eup %1254  ;;  %v129_v63 = vpop.permute.xlu1 %128  ;;  %v608_v0 = vmul.f32 1.442695, %v546_v62 }
  0xe7   :  { %v235_v1 = vmul.f32 %v1621_v47, %v129_v63  ;;  %v1083_v53 = vadd.f32 -1.0, %v1255_v35  ;;  %v99_v10 = vpop.permute.xlu2 %98 }
  0xe8   :  { %1256 = vpow2.f32 %v608_v0  ;;  %v229_v43 = vmul.f32 %v1621_v47, %v99_v10 }
  0xe9   :  { %v429_v6 = vadd.f32 %v397_v59, %v235_v1  ;;  %727 = vmatmul.f32.gmra.mxu0 %v649_v5  ;;  %v656_v7 = vsel %vm496_vm15, %v464_v15, %v1083_v53 }
  0xea   :  { %748 = vmatmul.f32.gmra.mxu1 %v656_v7  ;;  %v423_v26 = vadd.f32 %v391_v23, %v229_v43 }
  0xeb   :  { %v465_v8 = vadd.f32 %v1643_v58, %v429_v6 }
  0xec   :  { %v459_v32 = vadd.f32 %v1643_v58, %v423_v26 }
  0xed   :  { %v529_v12 = vmin.f32 %v465_v8, 0.0  ;;  %vm497_vm1 = vcmp.gt.f32.partialorder %v465_v8, 0.0 }
  0xee   :  { %v1257_v13 = vpop.eup %1256  ;;  %v219_v14 = vpop.permute.xlu1 %218  ;;  %v523_v38 = vmin.f32 %v459_v32, 0.0  ;;  %vm491_vm4 = vcmp.gt.f32.partialorder %v459_v32, 0.0 }
  0xef   :  { %v253_v16 = vmul.f32 %v1621_v47, %v219_v14  ;;  %v1101_v18 = vadd.f32 -1.0, %v1257_v13  ;;  %v574_v20 = vmul.f32 1.442695, %v529_v12  ;;  %v317_v25 = vpop.permute.xlu2 %316 }
  0xf0   :  { %v562_v48 = vmul.f32 1.442695, %v523_v38  ;;  %v399_v50 = vmul.f32 %v1616_v46, %v317_v25 }
  0xf1   :  { %v447_v21 = vadd.f32 %v415_v11, %v253_v16  ;;  %v674_v17 = vsel %vm514_vm0, %v482_v57, %v1101_v18  ;;  %1258 = vpow2.f32 %v574_v20  ;;  %v337_v11 = vpop.permute.xlu0 %336 }
  0xf2   :  { %802 = vmatmul.f32.gmra.mxu3 %v674_v17  ;;  %v404_v20 = vmul.f32 %v1616_v46, %v337_v11 }
  0xf3   :  { %v483_v4 = vadd.f32 %v1643_v58, %v447_v21 }
  0xf5   :  { %v547_v19 = vmin.f32 %v483_v4, 0.0  ;;  %vm515_vm2 = vcmp.gt.f32.partialorder %v483_v4, 0.0 }
  0xf7   :  { %v1259_v28 = vpop.eup %1258  ;;  %v281_v3 = vpop.permute.xlu1 %280  ;;  %v610_v29 = vmul.f32 1.442695, %v547_v19 }
  0xf8   :  { %v390_v31 = vmul.f32 %v1616_v46, %v281_v3  ;;  %v1084_v41 = vadd.f32 -1.0, %v1259_v28  ;;  %v289_v37 = vpop.permute.xlu2 %288 }
  0xf9   :  { %1260 = vpow2.f32 %v610_v29  ;;  %v392_v0 = vmul.f32 %v1616_v46, %v289_v37 }
  0xfa   :  { %v422_v33 = vadd.f32 %v390_v31, %v228_v27  ;;  %v657_v22 = vsel %vm497_vm1, %v465_v8, %v1084_v41 }
  0xfb   :  { %751 = vmatmul.f32.gmra.mxu1 %v657_v22 }
  0xfc   :  { %v458_v34 = vadd.f32 %v1643_v58, %v422_v33 }
  0xfe   :  { %v522_v56 = vmin.f32 %v458_v34, 0.0  ;;  %vm490_vm3 = vcmp.gt.f32.partialorder %v458_v34, 0.0 }
  0xff   :  { %v1261_v39 = vpop.eup %1260  ;;  %v313_v40 = vpop.permute.xlu1 %312 }
 0x100   :  { %v398_v2 = vmul.f32 %v1616_v46, %v313_v40  ;;  %v1102_v42 = vadd.f32 -1.0, %v1261_v39  ;;  %v560_v15 = vmul.f32 1.442695, %v522_v56  ;;  %v109_v55 = vpop.permute.xlu2 %108 }
 0x101   :  { %v231_v31 = vmul.f32 %v1621_v47, %v109_v55 }
 0x102   :  { %v430_v44 = vadd.f32 %v398_v2, %v236_v36  ;;  %v675_v45 = vsel %vm515_vm2, %v483_v4, %v1102_v42  ;;  %1262 = vpow2.f32 %v560_v15 }
 0x103   :  { %805 = vmatmul.f32.gmra.mxu3 %v675_v45  ;;  %1264 = vpow2.f32 %v562_v48 }
 0x104   :  { %v466_v49 = vadd.f32 %v1643_v58, %v430_v44 }
 0x106   :  { %v530_v30 = vmin.f32 %v466_v49, 0.0  ;;  %vm498_vm5 = vcmp.gt.f32.partialorder %v466_v49, 0.0 }
 0x108   :  { %v1263_v52 = vpop.eup %1262  ;;  %v139_v54 = vpop.permute.xlu1 %138  ;;  %v576_v57 = vmul.f32 1.442695, %v530_v30 }
 0x109   :  { %v237_v60 = vmul.f32 %v1621_v47, %v139_v54  ;;  %v1077_v61 = vadd.f32 -1.0, %v1263_v52  ;;  %v1265_v35 = vpop.eup %1264  ;;  %v164_v10 = vpop.permute.xlu2 %163 }
 0x10a   :  { %1266 = vpow2.f32 %v576_v57  ;;  %v1078_v1 = vadd.f32 -1.0, %v1265_v35  ;;  %v242_v18 = vmul.f32 %v1621_v47, %v164_v10  ;;  %v144_v57 = vpop.permute.xlu0 %143 }
 0x10b   :  { %v431_v62 = vadd.f32 %v399_v50, %v237_v60  ;;  %v650_v59 = vsel %vm490_vm3, %v458_v34, %v1077_v61  ;;  %v238_v10 = vmul.f32 %v1621_v47, %v144_v57 }
 0x10c   :  { %730 = vmatmul.f32.gmra.mxu0 %v650_v59  ;;  %v651_v13 = vsel %vm491_vm4, %v459_v32, %v1078_v1  ;;  %v436_v43 = vadd.f32 %v404_v20, %v242_v18 }
 0x10d   :  { %v467_v63 = vadd.f32 %v1643_v58, %v431_v62 }
 0x10e   :  { %v472_v28 = vadd.f32 %v1643_v58, %v436_v43 }
 0x10f   :  { %v531_v53 = vmin.f32 %v467_v63, 0.0  ;;  %vm499_vm6 = vcmp.gt.f32.partialorder %v467_v63, 0.0 }
 0x110   :  { %v1267_v5 = vpop.eup %1266  ;;  %v104_v6 = vpop.permute.xlu1 %103  ;;  %v536_v22 = vmin.f32 %v472_v28, 0.0  ;;  %vm504_vm9 = vcmp.gt.f32.partialorder %v472_v28, 0.0 }
 0x111   :  { %v230_v7 = vmul.f32 %v1621_v47, %v104_v6  ;;  %v1085_v8 = vadd.f32 -1.0, %v1267_v5  ;;  %v578_v9 = vmul.f32 1.442695, %v531_v53  ;;  %v297_v29 = vpop.permute.xlu2 %296 }
 0x112   :  { %v588_v39 = vmul.f32 1.442695, %v536_v22  ;;  %v394_v15 = vmul.f32 %v1616_v46, %v297_v29 }
 0x113   :  { %v424_v12 = vadd.f32 %v392_v0, %v230_v7  ;;  %v658_v14 = vsel %vm498_vm5, %v466_v49, %v1085_v8  ;;  %1268 = vpow2.f32 %v578_v9 }
 0x114   :  { %733 = vmatmul.f32.gmra.mxu0 %v651_v13  ;;  %754 = vmatmul.f32.gmra.mxu1 %v658_v14 }
 0x115   :  { %v460_v16 = vadd.f32 %v1643_v58, %v424_v12 }
 0x117   :  { %v524_v21 = vmin.f32 %v460_v16, 0.0  ;;  %vm492_vm7 = vcmp.gt.f32.partialorder %v460_v16, 0.0 }
 0x119   :  { %v1269_v17 = vpop.eup %1268  ;;  %v333_v23 = vpop.permute.xlu1 %332  ;;  %v564_v4 = vmul.f32 1.442695, %v524_v21 }
 0x11a   :  { %v403_v25 = vmul.f32 %v1616_v46, %v333_v23  ;;  %v1086_v19 = vadd.f32 -1.0, %v1269_v17  ;;  %v341_v2 = vpop.permute.xlu2 %340 }
 0x11b   :  { %1270 = vpow2.f32 %v564_v4  ;;  %v405_v55 = vmul.f32 %v1616_v46, %v341_v2 }
 0x11c   :  { %v435_v26 = vadd.f32 %v403_v25, %v241_v24  ;;  %v659_v27 = vsel %vm499_vm6, %v467_v63, %v1086_v19  ;;  %v1826_v63 = vpop.f32.mrf.mxu3 }
 0x11d   :  { %757 = vmatmul.f32.gmra.mxu1 %v659_v27 }
 0x11e   :  { %v471_v3 = vadd.f32 %v1643_v58, %v435_v26 }
 0x120   :  { %v535_v41 = vmin.f32 %v471_v3, 0.0  ;;  %vm503_vm8 = vcmp.gt.f32.partialorder %v471_v3, 0.0 }
 0x121   :  { %v1271_v32 = vpop.eup %1270  ;;  %v293_v33 = vpop.permute.xlu1 %292 }
 0x122   :  { %v393_v34 = vmul.f32 %v1616_v46, %v293_v33  ;;  %v1079_v36 = vadd.f32 -1.0, %v1271_v32  ;;  %v586_v37 = vmul.f32 1.442695, %v535_v41  ;;  %v149_v62 = vpop.permute.xlu2 %148 }
 0x123   :  { %v239_v25 = vmul.f32 %v1621_v47, %v149_v62 }
 0x124   :  { %v425_v56 = vadd.f32 %v393_v34, %v231_v31  ;;  %v652_v38 = vsel %vm492_vm7, %v460_v16, %v1079_v36  ;;  %1272 = vpow2.f32 %v586_v37  ;;  %v329_v16 = vpop.permute.xlu0 %328  ;;  %v1832_v21 = vpop.f32.mrf.mxu3 }
 0x125   :  { %736 = vmatmul.f32.gmra.mxu0 %v652_v38  ;;  %1274 = vpow2.f32 %v588_v39  ;;  %v402_v4 = vmul.f32 %v1616_v46, %v329_v16 }
 0x126   :  { %v461_v40 = vadd.f32 %v1643_v58, %v425_v56 }
 0x128   :  { %v525_v42 = vmin.f32 %v461_v40, 0.0  ;;  %vm493_vm10 = vcmp.gt.f32.partialorder %v461_v40, 0.0 }
 0x12a   :  { %v114_v44 = vpop.permute.xlu1 %113  ;;  %v566_v45 = vmul.f32 1.442695, %v525_v42  ;;  %v1273_v48 = vpop.eup %1272 }
 0x12b   :  { %v232_v49 = vmul.f32 %v1621_v47, %v114_v44  ;;  %v1090_v30 = vadd.f32 -1.0, %v1273_v48  ;;  %v1275_v52 = vpop.eup %1274  ;;  %v154_v14 = vpop.permute.xlu2 %153 }
 0x12c   :  { %1276 = vpow2.f32 %v566_v45  ;;  %v1091_v35 = vadd.f32 -1.0, %v1275_v52  ;;  %v240_v23 = vmul.f32 %v1621_v47, %v154_v14  ;;  %v1839_v33 = vpop.f32.mrf.mxu3 }
 0x12d   :  { %v426_v50 = vadd.f32 %v394_v15, %v232_v49  ;;  %v663_v51 = vsel %vm503_vm8, %v471_v3, %v1090_v30  ;;  %v1843_v30 = vpop.f32.mrf.mxu0 }
 0x12e   :  { %769 = vmatmul.f32.vlgmr.msra.gmra.mxu2 %v663_v51  ;;  %v664_v7 = vsel %vm504_vm9, %v472_v28, %v1091_v35  ;;  %v434_v27 = vadd.f32 %v402_v4, %v240_v23 }
 0x12f   :  { %v462_v54 = vadd.f32 %v1643_v58, %v426_v50 }
 0x130   :  { %v470_v22 = vadd.f32 %v1643_v58, %v434_v27 }
 0x131   :  { %v526_v60 = vmin.f32 %v462_v54, 0.0  ;;  %vm494_vm11 = vcmp.gt.f32.partialorder %v462_v54, 0.0 }
 0x132   :  { %v1277_v61 = vpop.eup %1276  ;;  %v169_v59 = vpop.permute.xlu1 %168  ;;  %v534_v36 = vmin.f32 %v470_v22, 0.0  ;;  %vm502_vm15 = vcmp.gt.f32.partialorder %v470_v22, 0.0 }
 0x133   :  { %v243_v0 = vmul.f32 %v1621_v47, %v169_v59  ;;  %v1080_v1 = vadd.f32 -1.0, %v1277_v61  ;;  %v568_v53 = vmul.f32 1.442695, %v526_v60  ;;  %v1854_v60 = vld [vmem:[%s2038_s4] ss:$0 sm:$0xff] }
 0x135   :  { %v437_v5 = vadd.f32 %v405_v55, %v243_v0  ;;  %v653_v6 = vsel %vm493_vm10, %v461_v40, %v1080_v1  ;;  %1278 = vpow2.f32 %v568_v53  ;;  %v788_v40 = vpop.f32.mrf.mxu3  ;;  %v1845_v51 = vpop.f32.mrf.mxu0 }
 0x136   :  { %739 = vmatmul.f32.gmra.mxu0 %v653_v6  ;;  %772 = vmatmul.f32.gmra.mxu2 %v664_v7 }
 0x137   :  { %v473_v8 = vadd.f32 %v1643_v58, %v437_v5 }
 0x139   :  { %v537_v9 = vmin.f32 %v473_v8, 0.0  ;;  %vm505_vm12 = vcmp.gt.f32.partialorder %v473_v8, 0.0 }
 0x13a   :  { %v1849_v55 = vpop.f32.mrf.mxu1 }
 0x13b   :  { %v1279_v11 = vpop.eup %1278  ;;  %v321_v12 = vpop.permute.xlu1 %320  ;;  %v590_v13 = vmul.f32 1.442695, %v537_v9 }
 0x13c   :  { %v400_v18 = vmul.f32 %v1616_v46, %v321_v12  ;;  %v1081_v20 = vadd.f32 -1.0, %v1279_v11 }
 0x13d   :  { %1280 = vpow2.f32 %v590_v13  ;;  %v791_v45 = vpop.f32.mrf.mxu3 }
 0x13e   :  { %v432_v17 = vadd.f32 %v400_v18, %v238_v10  ;;  %v654_v43 = vsel %vm494_vm11, %v462_v54, %v1081_v20  ;;  %v1847_v54 = vpop.f32.mrf.mxu0  ;;  %v1871_v16 = vadd.f32 %v1854_v60, %v791_v45 }
 0x13f   :  { %742 = vmatmul.f32.gmra.mxu0 %v654_v43 }
 0x140   :  { %v468_v24 = vadd.f32 %v1643_v58, %v432_v17  ;;  %vm835_vm6 = vcmp.gt.f32.partialorder %v1871_v16, 0.0 }
 0x142   :  { %v532_v19 = vmin.f32 %v468_v24, 0.0  ;;  %vm500_vm13 = vcmp.gt.f32.partialorder %v468_v24, 0.0 }
 0x143   :  { %v1281_v26 = vpop.eup %1280  ;;  %v325_v28 = vpop.permute.xlu1 %324 }
 0x144   :  { %v401_v3 = vmul.f32 %v1616_v46, %v325_v28  ;;  %v1092_v29 = vadd.f32 -1.0, %v1281_v26  ;;  %v580_v31 = vmul.f32 1.442695, %v532_v19  ;;  %v584_v46 = vmul.f32 1.442695, %v534_v36 }
 0x145   :  { %v794_v49 = vpop.f32.mrf.mxu3 }
 0x146   :  { %v433_v41 = vadd.f32 %v401_v3, %v239_v25  ;;  %v665_v32 = vsel %vm505_vm12, %v473_v8, %v1092_v29  ;;  %1282 = vpow2.f32 %v580_v31  ;;  %v1867_v12 = vadd.f32 %v1854_v60, %v794_v49 }
 0x147   :  { %775 = vmatmul.f32.gmra.mxu2 %v665_v32  ;;  %v867_v25 = vmin.f32 %v1871_v16, 0.0  ;;  %v1906_v49 = vadd.f32 %v1854_v60, %v1826_v63 }
 0x148   :  { %v469_v34 = vadd.f32 %v1643_v58, %v433_v41  ;;  %v868_v18 = vmin.f32 %v1867_v12, 0.0  ;;  %v1886_v41 = vadd.f32 %v1854_v60, %v1839_v33  ;;  %v1897_v33 = vadd.f32 %v1854_v60, %v1832_v21 }
 0x149   :  { %v925_v32 = vmul.f32 1.442695, %v867_v25  ;;  %vm836_vm4 = vcmp.gt.f32.partialorder %v1867_v12, 0.0 }
 0x14a   :  { %v533_v47 = vmin.f32 %v469_v34, 0.0  ;;  %vm501_vm14 = vcmp.gt.f32.partialorder %v469_v34, 0.0  ;;  %v927_v27 = vmul.f32 1.442695, %v868_v18  ;;  %vm833_vm10 = vcmp.gt.f32.partialorder %v1886_v41, 0.0 }
 0x14b   :  { %vm832_vm12 = vcmp.gt.f32.partialorder %v1897_v33, 0.0 }
 0x14c   :  { %v582_v37 = vmul.f32 1.442695, %v533_v47  ;;  %v1283_v56 = vpop.eup %1282 }
 0x14d   :  { %v1087_v38 = vadd.f32 -1.0, %v1283_v56  ;;  %v797_v50 = vpop.f32.mrf.mxu3  ;;  %v1856_v61 = vpop.f32.mrf.mxu0 }
 0x14e   :  { %1284 = vpow2.f32 %v582_v37  ;;  %v1864_v7 = vadd.f32 %v1854_v60, %v797_v50  ;;  %v864_v50 = vmin.f32 %v1897_v33, 0.0 }
 0x14f   :  { %v660_v39 = vsel %vm500_vm13, %v468_v24, %v1087_v38  ;;  %1286 = vpow2.f32 %v584_v46  ;;  %v1877_v24 = vadd.f32 %v1854_v60, %v788_v40  ;;  %v865_v40 = vmin.f32 %v1886_v41, 0.0 }
 0x150   :  { %760 = vmatmul.f32.gmra.mxu1 %v660_v39  ;;  %v869_v13 = vmin.f32 %v1864_v7, 0.0  ;;  %vm837_vm3 = vcmp.gt.f32.partialorder %v1864_v7, 0.0  ;;  %vm831_vm13 = vcmp.gt.f32.partialorder %v1906_v49, 0.0 }
 0x151   :  { %v866_v31 = vmin.f32 %v1877_v24, 0.0  ;;  %vm834_vm8 = vcmp.gt.f32.partialorder %v1877_v24, 0.0 }
 0x152   :  { %v929_v20 = vmul.f32 1.442695, %v869_v13 }
 0x153   :  { %v923_v46 = vmul.f32 1.442695, %v866_v31 }
 0x154   :  { %v1285_v2 = vpop.eup %1284 }
 0x155   :  { %v1088_v42 = vadd.f32 -1.0, %v1285_v2  ;;  %v1287_v44 = vpop.eup %1286 }
 0x156   :  { %v1089_v58 = vadd.f32 -1.0, %v1287_v44 }
 0x157   :  { %v661_v15 = vsel %vm501_vm14, %v469_v34, %v1088_v42 }
 0x158   :  { %763 = vmatmul.f32.gmra.mxu1 %v661_v15  ;;  %v662_v48 = vsel %vm502_vm15, %v470_v22, %v1089_v58 }
 0x15c   :  { %v800_v52 = vpop.f32.mrf.mxu3 }
 0x15d   :  { %v801_v0 = vadd.f32 %v1854_v60, %v800_v52  ;;  %v921_v52 = vmul.f32 1.442695, %v865_v40 }
 0x15e   :  { %v1860_v53 = vpop.f32.mrf.mxu0 }
 0x15f   :  { %v870_v8 = vmin.f32 %v801_v0, 0.0  ;;  %vm838_vm2 = vcmp.gt.f32.partialorder %v801_v0, 0.0 }
 0x160   :  { %766 = vmatmul.f32.gmra.mxu1 %v662_v48 }
 0x161   :  { %v931_v14 = vmul.f32 1.442695, %v870_v8 }
 0x166   :  { %v1874_v17 = vpop.f32.mrf.mxu0 }
 0x167   :  { %v749_v59 = vpop.f32.mrf.mxu1 }
 0x168   :  { %v1901_v42 = vadd.f32 %v1854_v60, %v749_v59 }
 0x16a   :  { %vm821_vm11 = vcmp.gt.f32.partialorder %v1901_v42, 0.0 }
 0x175   :  { %v803_v57 = vpop.f32.mrf.mxu3 }
 0x176   :  { %v804_v62 = vadd.f32 %v1854_v60, %v803_v57  ;;  %v1911_v57 = vadd.f32 %v1854_v60, %v1849_v55 }
 0x178   :  { %v871_v35 = vmin.f32 %v804_v62, 0.0  ;;  %v752_v9 = vpop.f32.mrf.mxu1  ;;  %vm839_vm1 = vcmp.gt.f32.partialorder %v804_v62, 0.0  ;;  %v852_v8 = vmin.f32 %v1911_v57, 0.0  ;;  %vm820_vm14 = vcmp.gt.f32.partialorder %v1911_v57, 0.0 }
 0x179   :  { %v1890_v34 = vadd.f32 %v1854_v60, %v752_v9 }
 0x17a   :  { %v933_v6 = vmul.f32 1.442695, %v871_v35 }
 0x17b   :  { %v854_v15 = vmin.f32 %v1890_v34, 0.0  ;;  %vm822_vm9 = vcmp.gt.f32.partialorder %v1890_v34, 0.0 }
 0x17c   :  { %1288 = vpow2.f32 %v933_v6  ;;  %v919_v6 = vmul.f32 1.442695, %v864_v50 }
 0x17d   :  { %v899_v59 = vmul.f32 1.442695, %v854_v15 }
 0x182   :  { %v1289_v23 = vpop.eup %1288 }
 0x183   :  { %v1133_v3 = vadd.f32 -1.0, %v1289_v23 }
 0x185   :  { %v999_v37 = vsel %vm839_vm1, %v804_v62, %v1133_v3  ;;  %v853_v62 = vmin.f32 %v1901_v42, 0.0 }
 0x186   :  { %v806_v1 = vpop.f32.mrf.mxu3 }
 0x187   :  { %v807_v5 = vadd.f32 %v1854_v60, %v806_v1  ;;  %v897_v9 = vmul.f32 1.442695, %v853_v62 }
 0x189   :  { %v872_v10 = vmin.f32 %v807_v5, 0.0  ;;  %vm840_vm0 = vcmp.gt.f32.partialorder %v807_v5, 0.0  ;;  %v1892_v47 = vpop.f32.mrf.mxu0 }
 0x18b   :  { %v935_v11 = vmul.f32 1.442695, %v872_v10 }
 0x18d   :  { %1290 = vpow2.f32 %v935_v11 }
 0x18e   :  { %1292 = vpow2.f32 %v931_v14 }
 0x18f   :  { %1294 = vpow2.f32 %v929_v20  ;;  %v895_v20 = vmul.f32 1.442695, %v852_v8 }
 0x190   :  { %1296 = vpow2.f32 %v927_v27 }
 0x191   :  { %v755_v43 = vpop.f32.mrf.mxu1  ;;  %1298 = vpow2.f32 %v925_v32  ;;  %v1916_v1 = vpop.f32.mrf.mxu0 }
 0x192   :  { %v1881_v19 = vadd.f32 %v1854_v60, %v755_v43  ;;  %1300 = vpow2.f32 %v923_v46 }
 0x193   :  { %v1291_v4 = vpop.eup %1290 }
 0x194   :  { %v1134_v26 = vadd.f32 -1.0, %v1291_v4  ;;  %v1293_v29 = vpop.eup %1292  ;;  %v855_v22 = vmin.f32 %v1881_v19, 0.0  ;;  %vm823_vm7 = vcmp.gt.f32.partialorder %v1881_v19, 0.0 }
 0x195   :  { %v1132_v56 = vadd.f32 -1.0, %v1293_v29  ;;  %v1295_v38 = vpop.eup %1294 }
 0x196   :  { %v1000_v28 = vsel %vm840_vm0, %v807_v5, %v1134_v26  ;;  %v901_v2 = vmul.f32 1.442695, %v855_v22  ;;  %v1131_v58 = vadd.f32 -1.0, %v1295_v38  ;;  %v1297_v48 = vpop.eup %1296  ;;  %v863_v5 = vmin.f32 %v1906_v49, 0.0 }
 0x197   :  { %1024 = vmatpush.xpose.msrb.mxu2 %v1000_v28  ;;  %v998_v45 = vsel %vm838_vm2, %v801_v0, %v1132_v56  ;;  %v1299_v35 = vpop.eup %1298  ;;  %v1130_v0 = vadd.f32 -1.0, %v1297_v48 }
 0x198   :  { %1302 = vpow2.f32 %v901_v2  ;;  %v997_v63 = vsel %vm837_vm3, %v1864_v7, %v1131_v58  ;;  %v1301_v55 = vpop.eup %1300  ;;  %v1129_v13 = vadd.f32 -1.0, %v1299_v35  ;;  %v917_v14 = vmul.f32 1.442695, %v863_v5 }
 0x199   :  { %v996_v11 = vsel %vm836_vm4, %v1867_v12, %v1130_v0  ;;  %v1128_v26 = vadd.f32 -1.0, %v1301_v55  ;;  %v1957_v0 = vadd.f32 %v1854_v60, %v1874_v17 }
 0x19a   :  { %v758_v36 = vpop.f32.mrf.mxu1  ;;  %v995_v4 = vsel %vm835_vm6, %v1871_v16, %v1129_v13 }
 0x19b   :  { %v759_v39 = vadd.f32 %v1854_v60, %v758_v36  ;;  %1025 = vmatpush.xpose.msrb.mxu2 %v999_v37  ;;  %v994_v29 = vsel %vm834_vm8, %v1877_v24, %v1128_v26  ;;  %vm814_vm6 = vcmp.gt.f32.partialorder %v1957_v0, 0.0 }
 0x19d   :  { %v856_v44 = vmin.f32 %v759_v39, 0.0  ;;  %vm824_vm5 = vcmp.gt.f32.partialorder %v759_v39, 0.0 }
 0x19e   :  { %v1303_v10 = vpop.eup %1302 }
 0x19f   :  { %v903_v21 = vmul.f32 1.442695, %v856_v44  ;;  %1026 = vmatpush.xpose.msrb.mxu2 %v998_v45  ;;  %v1117_v25 = vadd.f32 -1.0, %v1303_v10  ;;  %v846_v10 = vmin.f32 %v1957_v0, 0.0 }
 0x1a1   :  { %1304 = vpow2.f32 %v903_v21  ;;  %v983_v3 = vsel %vm823_vm7, %v1881_v19, %v1117_v25  ;;  %v1945_v21 = vadd.f32 %v1854_v60, %v1916_v1 }
 0x1a2   :  { %1306 = vpow2.f32 %v921_v52  ;;  %v737_v28 = vpop.f32.mrf.mxu0 }
 0x1a3   :  { %1027 = vmatpush.xpose.msrb.mxu2 %v997_v63  ;;  %1308 = vpow2.f32 %v899_v59  ;;  %v738_v58 = vadd.f32 %v1854_v60, %v737_v28  ;;  %vm816_vm2 = vcmp.gt.f32.partialorder %v1945_v21, 0.0 }
 0x1a4   :  { %1310 = vpow2.f32 %v919_v6 }
 0x1a5   :  { %1312 = vpow2.f32 %v897_v9  ;;  %v849_v50 = vmin.f32 %v738_v58, 0.0  ;;  %v1966_v9 = vadd.f32 %v1854_v60, %v1860_v53  ;;  %v1973_v53 = vadd.f32 %v1854_v60, %v1856_v61 }
 0x1a6   :  { %1314 = vpow2.f32 %v917_v14  ;;  %vm817_vm1 = vcmp.gt.f32.partialorder %v738_v58, 0.0 }
 0x1a7   :  { %v1305_v7 = vpop.eup %1304  ;;  %1028 = vmatpush.xpose.msrb.mxu2 %v996_v11  ;;  %1316 = vpow2.f32 %v895_v20  ;;  %v889_v35 = vmul.f32 1.442695, %v849_v50  ;;  %v845_v25 = vmin.f32 %v1966_v9, 0.0  ;;  %v844_v61 = vmin.f32 %v1973_v53, 0.0 }
 0x1a8   :  { %v1118_v18 = vadd.f32 -1.0, %v1305_v7  ;;  %v1307_v43 = vpop.eup %1306  ;;  %vm813_vm8 = vcmp.gt.f32.partialorder %v1966_v9, 0.0 }
 0x1a9   :  { %v1309_v27 = vpop.eup %1308  ;;  %v1127_v32 = vadd.f32 -1.0, %v1307_v43 }
 0x1aa   :  { %v984_v23 = vsel %vm824_vm5, %v759_v39, %v1118_v18  ;;  %v1311_v12 = vpop.eup %1310  ;;  %v1116_v31 = vadd.f32 -1.0, %v1309_v27  ;;  %v883_v27 = vmul.f32 1.442695, %v846_v10 }
 0x1ab   :  { %1004 = vmatpush.xpose.msrb.mxu1 %v984_v23  ;;  %1029 = vmatpush.xpose.msrb.mxu2 %v995_v4  ;;  %v1313_v16 = vpop.eup %1312  ;;  %v993_v37 = vsel %vm833_vm10, %v1886_v41, %v1127_v32  ;;  %v1126_v38 = vadd.f32 -1.0, %v1311_v12  ;;  %v1978_v32 = vadd.f32 %v1854_v60, %v1847_v54 }
 0x1ac   :  { %v1315_v22 = vpop.eup %1314  ;;  %v982_v36 = vsel %vm822_vm9, %v1890_v34, %v1116_v31  ;;  %v1115_v56 = vadd.f32 -1.0, %v1313_v16  ;;  %v881_v16 = vmul.f32 1.442695, %v845_v25  ;;  %vm812_vm9 = vcmp.gt.f32.partialorder %v1973_v53, 0.0 }
 0x1ad   :  { %v1317_v46 = vpop.eup %1316  ;;  %v1125_v24 = vadd.f32 -1.0, %v1315_v22  ;;  %v992_v2 = vsel %vm832_vm12, %v1897_v33, %v1126_v38  ;;  %v1983_v38 = vadd.f32 %v1854_v60, %v1845_v51  ;;  %v843_v54 = vmin.f32 %v1978_v32, 0.0 }
 0x1ae   :  { %v981_v40 = vsel %vm821_vm11, %v1901_v42, %v1115_v56  ;;  %v1114_v34 = vadd.f32 -1.0, %v1317_v46  ;;  %v1993_v51 = vadd.f32 %v1854_v60, %v1843_v30  ;;  %vm811_vm10 = vcmp.gt.f32.partialorder %v1978_v32, 0.0 }
 0x1af   :  { %1005 = vmatpush.xpose.msrb.mxu1 %v983_v3  ;;  %1030 = vmatpush.xpose.msrb.mxu2 %v994_v29  ;;  %v991_v45 = vsel %vm831_vm13, %v1906_v49, %v1125_v24  ;;  %v1949_v49 = vadd.f32 %v1854_v60, %v1892_v47  ;;  %v879_v24 = vmul.f32 1.442695, %v844_v61  ;;  %vm810_vm12 = vcmp.gt.f32.partialorder %v1983_v38, 0.0  ;;  %v1001_v61 = vld [vmem:[%s2039_s5] sm:$0x1] }
 0x1b0   :  { %v980_v44 = vsel %vm820_vm14, %v1911_v57, %v1114_v34  ;;  %v848_v57 = vmin.f32 %v1945_v21, 0.0  ;;  %v841_v30 = vmin.f32 %v1993_v51, 0.0  ;;  %vm809_vm14 = vcmp.gt.f32.partialorder %v1993_v51, 0.0 }
 0x1b1   :  { %v770_v15 = vpop.f32.mrf.mxu2  ;;  %v847_v1 = vmin.f32 %v1949_v49, 0.0  ;;  %vm815_vm4 = vcmp.gt.f32.partialorder %v1949_v49, 0.0 }
 0x1b2   :  { %v887_v5 = vmul.f32 1.442695, %v848_v57  ;;  %v1962_v8 = vadd.f32 %v1854_v60, %v770_v15 }
 0x1b3   :  { %v740_v19 = vpop.f32.mrf.mxu0  ;;  %1006 = vmatpush.xpose.msrb.mxu1 %v982_v36  ;;  %1031 = vmatpush.xpose.msrb.mxu2 %v993_v37  ;;  %v885_v13 = vmul.f32 1.442695, %v847_v1 }
 0x1b4   :  { %v741_v39 = vadd.f32 %v1854_v60, %v740_v19  ;;  %v860_v23 = vmin.f32 %v1962_v8, 0.0  ;;  %vm828_vm7 = vcmp.gt.f32.partialorder %v1962_v8, 0.0 }
 0x1b6   :  { %v850_v41 = vmin.f32 %v741_v39, 0.0  ;;  %vm818_vm0 = vcmp.gt.f32.partialorder %v741_v39, 0.0  ;;  %v911_v31 = vmul.f32 1.442695, %v860_v23 }
 0x1b7   :  { %1007 = vmatpush.xpose.msrb.mxu1 %v981_v40  ;;  %1032 = vmatpush.xpose.msrb.mxu2 %v992_v2 }
 0x1b8   :  { %v891_v48 = vmul.f32 1.442695, %v850_v41 }
 0x1b9   :  { %v773_v62 = vpop.f32.mrf.mxu2 }
 0x1ba   :  { %1318 = vpow2.f32 %v891_v48  ;;  %v1953_v63 = vadd.f32 %v1854_v60, %v773_v62 }
 0x1bb   :  { %1008 = vmatpush.xpose.msrb.mxu1 %v980_v44  ;;  %1033 = vmatpush.xpose.msrb.mxu2 %v991_v45 }
 0x1bc   :  { %v743_v42 = vpop.f32.mrf.mxu0  ;;  %v861_v55 = vmin.f32 %v1953_v63, 0.0  ;;  %vm829_vm5 = vcmp.gt.f32.partialorder %v1953_v63, 0.0 }
 0x1bd   :  { %v744_v33 = vadd.f32 %v1854_v60, %v743_v42  ;;  %v877_v42 = vmul.f32 1.442695, %v843_v54 }
 0x1be   :  { %v913_v14 = vmul.f32 1.442695, %v861_v55 }
 0x1bf   :  { %v851_v52 = vmin.f32 %v744_v33, 0.0  ;;  %vm819_vm15 = vcmp.gt.f32.partialorder %v744_v33, 0.0 }
 0x1c0   :  { %v1319_v6 = vpop.eup %1318 }
 0x1c1   :  { %v893_v59 = vmul.f32 1.442695, %v851_v52  ;;  %v1112_v20 = vadd.f32 -1.0, %v1319_v6 }
 0x1c3   :  { %1320 = vpow2.f32 %v893_v59  ;;  %v978_v12 = vsel %vm818_vm0, %v741_v39, %v1112_v20  ;;  %vm1047_vm0 = vcmask 1040384  }
 0x1c4   :  { %1322 = vpow2.f32 %v889_v35 }
 0x1c5   :  { %1324 = vpow2.f32 %v887_v5 }
 0x1c6   :  { %1326 = vpow2.f32 %v885_v13 }
 0x1c7   :  { %1328 = vpow2.f32 %v913_v14 }
 0x1c9   :  { %v1321_v47 = vpop.eup %1320 }
 0x1ca   :  { %v776_v11 = vpop.f32.mrf.mxu2  ;;  %v1113_v17 = vadd.f32 -1.0, %v1321_v47  ;;  %v1323_v43 = vpop.eup %1322 }
 0x1cb   :  { %v777_v7 = vadd.f32 %v1854_v60, %v776_v11  ;;  %v1111_v3 = vadd.f32 -1.0, %v1323_v43  ;;  %v1325_v29 = vpop.eup %1324  ;;  %v873_v11 = vmul.f32 1.442695, %v841_v30 }
 0x1cc   :  { %v979_v18 = vsel %vm819_vm15, %v744_v33, %v1113_v17  ;;  %v1110_v36 = vadd.f32 -1.0, %v1325_v29  ;;  %v1327_v37 = vpop.eup %1326 }
 0x1cd   :  { %v862_v4 = vmin.f32 %v777_v7, 0.0  ;;  %1009 = vmatpush.xpose.msrb.mxu1 %v979_v18  ;;  %v761_v26 = vpop.f32.mrf.mxu1  ;;  %v977_v22 = vsel %vm817_vm1, %v738_v58, %v1111_v3  ;;  %v1329_v56 = vpop.eup %1328  ;;  %v1109_v34 = vadd.f32 -1.0, %v1327_v37  ;;  %vm830_vm3 = vcmp.gt.f32.partialorder %v777_v7, 0.0 }
 0x1ce   :  { %v976_v40 = vsel %vm816_vm2, %v1945_v21, %v1110_v36  ;;  %v1123_v44 = vadd.f32 -1.0, %v1329_v56  ;;  %v842_v58 = vmin.f32 %v1983_v38, 0.0  ;;  %v2000_v52 = vadd.f32 %v1854_v60, %v761_v26 }
 0x1cf   :  { %v915_v28 = vmul.f32 1.442695, %v862_v4  ;;  %v975_v48 = vsel %vm815_vm4, %v1949_v49, %v1109_v34  ;;  %v1050_v36 = vlaneseq }
 0x1d0   :  { %v989_v59 = vsel %vm829_vm5, %v1953_v63, %v1123_v44  ;;  %v875_v35 = vmul.f32 1.442695, %v842_v58  ;;  %v857_v47 = vmin.f32 %v2000_v52, 0.0  ;;  %vm825_vm15 = vcmp.gt.f32.partialorder %v2000_v52, 0.0 }
 0x1d1   :  { %1330 = vpow2.f32 %v915_v28  ;;  %1010 = vmatpush.xpose.msrb.mxu1 %v978_v12  ;;  %vm1052_vm1 = vcmp.lt.s32.totalorder %v1050_v36, 256 }
 0x1d2   :  { %1332 = vpow2.f32 %v883_v27 }
 0x1d3   :  { %1334 = vpow2.f32 %v911_v31 }
 0x1d4   :  { %1336 = vpow2.f32 %v881_v16  ;;  %v1003_v16 = vstv %s2040_s6 }
 0x1d5   :  { %1011 = vmatpush.xpose.msrb.mxu1 %v977_v22  ;;  %v764_v46 = vpop.f32.mrf.mxu1  ;;  %1338 = vpow2.f32 %v879_v24 }
 0x1d6   :  { %v1988_v39 = vadd.f32 %v1854_v60, %v764_v46  ;;  %1340 = vpow2.f32 %v877_v42 }
 0x1d7   :  { %v1331_v19 = vpop.eup %1330  ;;  %1342 = vpow2.f32 %v875_v35 }
 0x1d8   :  { %v1124_v2 = vadd.f32 -1.0, %v1331_v19  ;;  %v1333_v15 = vpop.eup %1332  ;;  %v858_v33 = vmin.f32 %v1988_v39, 0.0  ;;  %vm826_vm13 = vcmp.gt.f32.partialorder %v1988_v39, 0.0 }
 0x1d9   :  { %1012 = vmatpush.xpose.msrb.mxu1 %v976_v40  ;;  %v1335_v45 = vpop.eup %1334  ;;  %v1108_v21 = vadd.f32 -1.0, %v1333_v15 }
 0x1da   :  { %v990_v41 = vsel %vm830_vm3, %v777_v7, %v1124_v2  ;;  %v1337_v50 = vpop.eup %1336  ;;  %v1122_v57 = vadd.f32 -1.0, %v1335_v45  ;;  %v907_v49 = vmul.f32 1.442695, %v858_v33  ;;  %v905_v7 = vmul.f32 1.442695, %v857_v47 }
 0x1db   :  { %1034 = vmatpush.xpose.msrb.mxu2 %v990_v41  ;;  %v974_v5 = vsel %vm814_vm6, %v1957_v0, %v1108_v21  ;;  %v1107_v6 = vadd.f32 -1.0, %v1337_v50  ;;  %v1339_v55 = vpop.eup %1338 }
 0x1dc   :  { %v988_v63 = vsel %vm828_vm7, %v1962_v8, %v1122_v57  ;;  %1344 = vpow2.f32 %v907_v49  ;;  %v1106_v0 = vadd.f32 -1.0, %v1339_v55  ;;  %v1341_v13 = vpop.eup %1340 }
 0x1dd   :  { %1013 = vmatpush.xpose.msrb.mxu1 %v975_v48  ;;  %v767_v62 = vpop.f32.mrf.mxu1  ;;  %v1105_v8 = vadd.f32 -1.0, %v1341_v13  ;;  %v1343_v18 = vpop.eup %1342 }
 0x1de   :  { %v768_v1 = vadd.f32 %v1854_v60, %v767_v62  ;;  %v973_v60 = vsel %vm813_vm8, %v1966_v9, %v1107_v6  ;;  %v972_v14 = vsel %vm812_vm9, %v1973_v53, %v1106_v0  ;;  %v1104_v4 = vadd.f32 -1.0, %v1343_v18 }
 0x1df   :  { %1035 = vmatpush.xpose.msrb.mxu2 %v989_v59  ;;  %v971_v9 = vsel %vm811_vm10, %v1978_v32, %v1105_v8 }
 0x1e0   :  { %v859_v10 = vmin.f32 %v768_v1, 0.0  ;;  %vm827_vm11 = vcmp.gt.f32.partialorder %v768_v1, 0.0  ;;  %v970_v53 = vsel %vm810_vm12, %v1983_v38, %v1104_v4 }
 0x1e1   :  { %1014 = vmatpush.xpose.msrb.mxu1 %v974_v5 }
 0x1e2   :  { %v909_v17 = vmul.f32 1.442695, %v859_v10  ;;  %v1345_v20 = vpop.eup %1344 }
 0x1e3   :  { %1036 = vmatpush.xpose.msrb.mxu2 %v988_v63  ;;  %v1120_v27 = vadd.f32 -1.0, %v1345_v20 }
 0x1e4   :  { %1346 = vpow2.f32 %v909_v17 }
 0x1e5   :  { %1015 = vmatpush.xpose.msrb.mxu1 %v973_v60  ;;  %1348 = vpow2.f32 %v873_v11  ;;  %v986_v3 = vsel %vm826_vm13, %v1988_v39, %v1120_v27 }
 0x1e6   :  { %1350 = vpow2.f32 %v905_v7 }
 0x1e9   :  { %1016 = vmatpush.xpose.msrb.mxu1 %v972_v14 }
 0x1ea   :  { %v1347_v43 = vpop.eup %1346 }
 0x1eb   :  { %v1121_v23 = vadd.f32 -1.0, %v1347_v43  ;;  %v1349_v25 = vpop.eup %1348 }
 0x1ec   :  { %v1351_v28 = vpop.eup %1350  ;;  %v1103_v12 = vadd.f32 -1.0, %v1349_v25 }
 0x1ed   :  { %1017 = vmatpush.xpose.msrb.mxu1 %v971_v9  ;;  %v987_v26 = vsel %vm827_vm11, %v768_v1, %v1121_v23  ;;  %v1119_v29 = vadd.f32 -1.0, %v1351_v28 }
 0x1ee   :  { %1037 = vmatpush.xpose.msrb.mxu2 %v987_v26  ;;  %v969_v31 = vsel %vm809_vm14, %v1993_v51, %v1103_v12 }
 0x1ef   :  { %v985_v32 = vsel %vm825_vm15, %v2000_v52, %v1119_v29 }
 0x1f1   :  { %1018 = vmatpush.xpose.msrb.mxu1 %v970_v53 }
 0x1f2   :  { %1038 = vmatpush.xpose.msrb.mxu2 %v986_v3 }
 0x1f5   :  { %1019 = vmatpush.xpose.msrb.mxu1 %v969_v31 }
 0x1f6   :  { %1039 = vmatpush.xpose.msrb.mxu2 %v985_v32 }
 0x1f8   :  { %1020 = vmatmul.f32.vlgmr.msrb.gmra.mxu1 %v1001_v61 }
 0x1f9   :  { %1040 = vmatmul.f32.vlgmr.msrb.gmra.mxu2 %v1001_v61 }
 0x275   :  { %v1021_v22 = vpop.f32.mrf.mxu1 }
 0x276   :  { %v1022_v38 = vadd.f32 %v1021_v22, %v1003_v16 }
 0x27c   :  { %v1041_v37 = vpop.f32.mrf.mxu2 }
 0x27d   :  { %v1042_v56 = vadd.f32 %v1041_v37, %v1003_v16 }
 0x27f   :  { %v1046_v46 = vrot.slane %v1042_v56, 7 }
 0x281   :  { %v1048_v19 = vsel %vm1047_vm0, %v1022_v38, %v1046_v46 }
 0x282   :  { %1054 = vst.msk [vmem:[#allocation3] sm:$0x3] %vm1052_vm1, %v1048_v19 }
 0x283   :  { %1065 = dma.vmem_to_hbm [thread:$0]  %s1061_s12, 32, %s1063_s14, [#allocation4]  }
 0x284   :  { %1376 = dma.done.wait [#allocation4], 32  }
 0x285   :  { %1377 = vsyncadd [#allocation4], 4294967264 }
 0x286   :  { %1070 = vsyncpa [#allocation4], 1 }

</bundles_post_ra>
